<compile_context>
chip_gen: v6e
topology: v6e:2x2x1
jax: 0.10.0
libtpu: 0.0.40
codegen_flags: <defaults>
</compile_context>

<pallas_src>
import functools

import jax
import jax.numpy as jnp
from jax.experimental import pallas as pl
from jax.experimental.pallas import tpu as pltpu

_LANE = 128
_SUBLANE = 8
_TILE_VMEM_BUDGET = 8 * 1024 * 1024    # per-call working-set target (fits v5e default scoped VMEM)
_VMEM_LIMIT = 32 * 1024 * 1024         # scoped VMEM limit with headroom (<= v7x 64 MiB physical)
_NCORE = 2                             # stats-pass core split (helps v7x; harmless on 1-TC chips)


def _round_up(x, m):
    return (x + m - 1) // m * m


def _pick_tile_rows(n_rows, bytes_per_row, budget=_TILE_VMEM_BUDGET, cap=1024):
    """Largest power-of-two row tile (>=8, <=cap) whose double-buffered working
    set fits `budget`; never larger than the (8-rounded) problem itself."""
    tm = cap
    while tm > _SUBLANE and 2 * tm * bytes_per_row > budget:
        tm //= 2
    return max(_SUBLANE, min(tm, _round_up(n_rows, _SUBLANE)))


# ---------------------------------------------------------------------------
# Pass 1:  P = ReLU(X) @ Wmat     X: (M, Cin)   Wmat: (Cin, KH*KW*Cout)
# ---------------------------------------------------------------------------
def _relu_matmul_kernel(x_ref, w_ref, y_ref, *, use_vpu):
    x = jnp.maximum(x_ref[...], 0.0)          # ReLU on the un-expanded input tile
    w = w_ref[...]
    if use_vpu:
        # Tiny contraction dim: exact f32 outer-product accumulation on the VPU.
        # (At K=Cin<=16 the MXU would be almost idle, and this avoids any MXU
        # precision question without Precision.HIGHEST.)
        acc = x[:, 0:1] * w[0:1, :]
        for ci in range(1, w.shape[0]):
            acc = acc + x[:, ci:ci + 1] * w[ci:ci + 1, :]
        y_ref[...] = acc
    else:
        # Larger Cin: MXU matmul, default precision (no Precision.HIGHEST),
        # f32 accumulation.
        y_ref[...] = jnp.dot(x, w, preferred_element_type=jnp.float32)


# ---------------------------------------------------------------------------
# Pass 2a: lane-dense per-lane sum / sum-of-squares (training-mode BN stats)
# ---------------------------------------------------------------------------
def _stats_kernel(y_ref, ssum_ref, ssq_ref):
    @pl.when(pl.program_id(1) == 0)
    def _():
        ssum_ref[...] = jnp.zeros_like(ssum_ref)
        ssq_ref[...] = jnp.zeros_like(ssq_ref)

    y = y_ref[...]
    ssum_ref[...] += jnp.sum(y, axis=0, keepdims=True)[None]
    ssq_ref[...] += jnp.sum(y * y, axis=0, keepdims=True)[None]


# ---------------------------------------------------------------------------
# Pass 2b: in-place fused BN finalize:  o = y * scale + shift
# ---------------------------------------------------------------------------
def _affine_kernel(y_ref, scale_ref, shift_ref, o_ref):
    o_ref[...] = y_ref[...] * scale_ref[...] + shift_ref[...]


def deconv_block(x_nchw, weight, bias, gamma, beta, *,
                 stride=2, padding=1, batch_norm=True, dropout=False, eps=1e-5):
    """Forward of DeconvBlock. x_nchw: (N, Cin, H, W) -> (N, Cout, Hout, Wout)."""
    if dropout:
        # TODO(synk): training-mode Dropout(0.5) (dropout=True) is not implemented.
        raise NotImplementedError("DeconvBlock dropout=True path is not implemented")

    N, Cin, H, W = x_nchw.shape
    _, Cout, KH, KW = weight.shape
    Hout = (H - 1) * stride - 2 * padding + KH
    Wout = (W - 1) * stride - 2 * padding + KW
    KWC = KH * KW * Cout

    # ---- Pass 1: per-input-pixel contributions ------------------------------
    # Wmat[ci, (kh,kw,co)] = weight[ci, co, kh, kw] (no spatial flip in the
    # scatter formulation of ConvTranspose2d).
    x_flat = jnp.transpose(x_nchw, (0, 2, 3, 1)).reshape(N * H * W, Cin).astype(jnp.float32)
    w_mat = jnp.transpose(weight, (0, 2, 3, 1)).reshape(Cin, KWC).astype(jnp.float32)
    # NOTE: assumes the (Cin, KH*KW*Cout) weight tile fits VMEM; tile Cin/Cout
    # further for extremely large layers.

    M1 = N * H * W
    budget1 = max(_TILE_VMEM_BUDGET - 2 * Cin * KWC * 4, 1 << 20)
    TM1 = _pick_tile_rows(M1, (Cin + KWC) * 4, budget1)
    M1p = _round_up(M1, TM1)
    x_pad = jnp.pad(x_flat, ((0, M1p - M1), (0, 0)))   # zero rows -> zero outputs, sliced off

    kernel1 = functools.partial(_relu_matmul_kernel, use_vpu=(Cin <= 16))
    p = pl.pallas_call(
        kernel1,
        grid=(M1p // TM1,),
        in_specs=[pl.BlockSpec((TM1, Cin), lambda i: (i, 0)),
                  pl.BlockSpec((Cin, KWC), lambda i: (0, 0))],
        out_specs=pl.BlockSpec((TM1, KWC), lambda i: (i, 0)),
        out_shape=jax.ShapeDtypeStruct((M1p, KWC), jnp.float32),
        compiler_params=pltpu.CompilerParams(
            dimension_semantics=("parallel",), vmem_limit_bytes=_VMEM_LIMIT),
    )(x_pad, w_mat)[:M1]

    # ---- Overlap-add (col2im): scatter tap (kh,kw) of pixel (h,w) to ---------
    # (ho, wo) = (h*s - pad + kh, w*s - pad + kw).  Pure data movement.
    # TODO(synk): could be fused into a Pallas kernel with halo'd strided stores
    # to avoid the P round-trip through HBM entirely.
    p6 = p.reshape(N, H, W, KH, KW, Cout)
    h_span, w_span = (H - 1) * stride + 1, (W - 1) * stride + 1
    out_full = jnp.zeros((N, (H - 1) * stride + KH, (W - 1) * stride + KW, Cout),
                         jnp.float32)
    for kh in range(KH):
        for kw in range(KW):
            out_full = out_full.at[:, kh:kh + h_span:stride,
                                   kw:kw + w_span:stride, :].add(p6[:, :, :, kh, kw, :])
    out = out_full[:, padding:padding + Hout, padding:padding + Wout, :]

    if not batch_norm:
        out = out + bias.astype(jnp.float32)           # plain deconv keeps its bias
        return jnp.transpose(out, (0, 3, 1, 2))

    # bias is omitted when batch_norm=True: a per-channel constant shift is
    # exactly cancelled by training-mode mean subtraction (also improves the
    # conditioning of E[y^2] - E[y]^2).

    # ---- Pass 2: training-mode BatchNorm2d over the deconv output ------------
    M2 = N * Hout * Wout
    reps = _LANE // Cout if (Cout <= _LANE and _LANE % Cout == 0) else 1
    LANE = Cout * reps                                 # lane-dense view width
    y2 = out.reshape(M2, Cout)

    Mr = _round_up(M2, reps) // reps
    TM2 = _pick_tile_rows(-(-Mr // _NCORE), 2 * LANE * 4)
    Mrp = _round_up(Mr, _NCORE * TM2)
    # Zero padding is stats-neutral (adds 0 to sum and sum-of-squares); the true
    # element count M2 is used for the mean/variance below.
    yl = jnp.pad(y2, ((0, Mrp * reps - M2), (0, 0))).reshape(Mrp, LANE)

    tiles_per_core = Mrp // TM2 // _NCORE
    ssum, ssq = pl.pallas_call(
        _stats_kernel,
        grid=(_NCORE, tiles_per_core),
        in_specs=[pl.BlockSpec((TM2, LANE),
                               lambda c, i: (c * tiles_per_core + i, 0))],
        out_specs=[pl.BlockSpec((1, 1, LANE), lambda c, i: (c, 0, 0)),
                   pl.BlockSpec((1, 1, LANE), lambda c, i: (c, 0, 0))],
        out_shape=[jax.ShapeDtypeStruct((_NCORE, 1, LANE), jnp.float32)] * 2,
        compiler_params=pltpu.CompilerParams(
            dimension_semantics=("parallel", "arbitrary"),
            vmem_limit_bytes=_VMEM_LIMIT),
    )(yl)

    # Tiny (Cout,) finalize: fold per-core partials + lane replicas, then fuse
    # the whole BN into one per-element multiply-add.
    csum = jnp.sum(ssum.reshape(_NCORE * reps, Cout), axis=0)
    csq = jnp.sum(ssq.reshape(_NCORE * reps, Cout), axis=0)
    count = jnp.float32(M2)
    mean = csum / count
    var = csq / count - mean * mean                    # biased (training-mode) variance
    scale = gamma.astype(jnp.float32) * jax.lax.rsqrt(var + eps)
    shift = beta.astype(jnp.float32) - mean * scale
    scale_l = jnp.tile(scale, reps).reshape(1, LANE)
    shift_l = jnp.tile(shift, reps).reshape(1, LANE)

    yn = pl.pallas_call(
        _affine_kernel,
        grid=(Mrp // TM2,),
        in_specs=[pl.BlockSpec((TM2, LANE), lambda i: (i, 0)),
                  pl.BlockSpec((1, LANE), lambda i: (0, 0)),
                  pl.BlockSpec((1, LANE), lambda i: (0, 0))],
        out_specs=pl.BlockSpec((TM2, LANE), lambda i: (i, 0)),
        out_shape=jax.ShapeDtypeStruct((Mrp, LANE), jnp.float32),
        input_output_aliases={0: 0},                   # normalize in place (no extra y copy)
        compiler_params=pltpu.CompilerParams(
            dimension_semantics=("parallel",), vmem_limit_bytes=_VMEM_LIMIT),
    )(yl, scale_l, shift_l)

    out_nhwc = yn.reshape(Mrp * reps, Cout)[:M2].reshape(N, Hout, Wout, Cout)
    return jnp.transpose(out_nhwc, (0, 3, 1, 2))       # back to NCHW


def _reference_forward(x, weight, bias, gamma, beta, stride, padding,
                       batch_norm, eps=1e-5):
    """Plain-JAX reference matching the PyTorch forward (training-mode BN)."""
    _, _, KH, KW = weight.shape
    xr = jnp.maximum(x, 0.0)
    w = jnp.transpose(weight[:, :, ::-1, ::-1], (1, 0, 2, 3))          # OIHW
    y = jax.lax.conv_general_dilated(
        xr, w, window_strides=(1, 1),
        padding=[(KH - 1 - padding, KH - 1 - padding),
                 (KW - 1 - padding, KW - 1 - padding)],
        lhs_dilation=(stride, stride),
        dimension_numbers=("NCHW", "OIHW", "NCHW"),
        precision=jax.lax.Precision.HIGHEST)
    y = y + bias[None, :, None, None]
    if batch_norm:
        mean = jnp.mean(y, axis=(0, 2, 3), keepdims=True)
        var = jnp.var(y, axis=(0, 2, 3), keepdims=True)
        y = ((y - mean) * jax.lax.rsqrt(var + eps)
             * gamma[None, :, None, None] + beta[None, :, None, None])
    return y


if __name__ == "__main__":
    key = jax.random.PRNGKey(0)
    k1, k2, k3, k4, k5 = jax.random.split(key, 5)

    N, Cin, H, W = 2, 4, 16, 16
    Cout, KH, KW = 8, 4, 4
    stride, padding = 2, 1

    # Deterministic synthetic parameters (shapes from ConvTranspose2d / BatchNorm2d).
    x = jax.random.normal(k1, (N, Cin, H, W), jnp.float32)
    weight = 0.1 * jax.random.normal(k2, (Cin, Cout, KH, KW), jnp.float32)
    bias = 0.1 * jax.random.normal(k3, (Cout,), jnp.float32)
    gamma = 1.0 + 0.1 * jax.random.normal(k4, (Cout,), jnp.float32)
    beta = 0.1 * jax.random.normal(k5, (Cout,), jnp.float32)

    fwd = jax.jit(functools.partial(deconv_block, stride=stride, padding=padding,
                                    batch_norm=True, dropout=False))
    out = jax.block_until_ready(fwd(x, weight, bias, gamma, beta))
    assert out.shape == (N, Cout, 2 * H, 2 * W), out.shape

    ref = _reference_forward(x, weight, bias, gamma, beta, stride, padding, True)
    max_err = float(jnp.max(jnp.abs(out - ref)))
    if not bool(jnp.allclose(out, ref, atol=1e-3, rtol=1e-3)):
        raise AssertionError(f"Pallas kernel mismatch vs reference, max abs err {max_err}")

    print("KERNEL_OK")
</pallas_src>

<mosaic_0001>
module attributes {stable_mosaic.version = 11 : i64} {
  func.func @_relu_matmul_kernel(%arg0: i32, %arg1: memref<512x4xf32, #tpu.memory_space<vmem>>, %arg2: memref<4x128xf32, #tpu.memory_space<vmem>>, %arg3: memref<512x128xf32, #tpu.memory_space<vmem>>) attributes {dimension_semantics = [#tpu.dimension_semantics<parallel>], iteration_bounds = array<i64: 1>, scalar_prefetch = 0 : i64, scratch_operands = 0 : i64, tpu.core_type = #tpu.core_type<tc>, window_params = [{transform_indices = @transform_0, window_bounds = array<i64: 512, 4>}, {pipeline_mode = #tpu.pipeline_mode<synchronous>, transform_indices = @transform_1, window_bounds = array<i64: 4, 128>}, {transform_indices = @transform_2, window_bounds = array<i64: 512, 128>}]} {
    %c0 = arith.constant 0 : index
    %c0_0 = arith.constant 0 : index
    %0 = vector.load %arg1[%c0, %c0_0] : memref<512x4xf32, #tpu.memory_space<vmem>>, vector<512x4xf32>
    %cst = arith.constant 0.000000e+00 : f32
    %1 = vector.broadcast %cst : f32 to vector<512x4xf32>
    %2 = arith.maximumf %0, %1 : vector<512x4xf32>
    %c0_1 = arith.constant 0 : index
    %c0_2 = arith.constant 0 : index
    %3 = vector.load %arg2[%c0_1, %c0_2] : memref<4x128xf32, #tpu.memory_space<vmem>>, vector<4x128xf32>
    %4 = vector.extract_strided_slice %2 {offsets = [0, 0], sizes = [512, 1], strides = [1, 1]} : vector<512x4xf32> to vector<512x1xf32>
    %5 = vector.extract_strided_slice %3 {offsets = [0, 0], sizes = [1, 128], strides = [1, 1]} : vector<4x128xf32> to vector<1x128xf32>
    %6 = vector.broadcast %4 : vector<512x1xf32> to vector<512x128xf32>
    %7 = vector.broadcast %5 : vector<1x128xf32> to vector<512x128xf32>
    %8 = arith.mulf %6, %7 : vector<512x128xf32>
    %9 = vector.extract_strided_slice %2 {offsets = [0, 1], sizes = [512, 1], strides = [1, 1]} : vector<512x4xf32> to vector<512x1xf32>
    %10 = vector.extract_strided_slice %3 {offsets = [1, 0], sizes = [1, 128], strides = [1, 1]} : vector<4x128xf32> to vector<1x128xf32>
    %11 = vector.broadcast %9 : vector<512x1xf32> to vector<512x128xf32>
    %12 = vector.broadcast %10 : vector<1x128xf32> to vector<512x128xf32>
    %13 = arith.mulf %11, %12 : vector<512x128xf32>
    %14 = arith.addf %8, %13 : vector<512x128xf32>
    %15 = vector.extract_strided_slice %2 {offsets = [0, 2], sizes = [512, 1], strides = [1, 1]} : vector<512x4xf32> to vector<512x1xf32>
    %16 = vector.extract_strided_slice %3 {offsets = [2, 0], sizes = [1, 128], strides = [1, 1]} : vector<4x128xf32> to vector<1x128xf32>
    %17 = vector.broadcast %15 : vector<512x1xf32> to vector<512x128xf32>
    %18 = vector.broadcast %16 : vector<1x128xf32> to vector<512x128xf32>
    %19 = arith.mulf %17, %18 : vector<512x128xf32>
    %20 = arith.addf %14, %19 : vector<512x128xf32>
    %21 = vector.extract_strided_slice %2 {offsets = [0, 3], sizes = [512, 1], strides = [1, 1]} : vector<512x4xf32> to vector<512x1xf32>
    %22 = vector.extract_strided_slice %3 {offsets = [3, 0], sizes = [1, 128], strides = [1, 1]} : vector<4x128xf32> to vector<1x128xf32>
    %23 = vector.broadcast %21 : vector<512x1xf32> to vector<512x128xf32>
    %24 = vector.broadcast %22 : vector<1x128xf32> to vector<512x128xf32>
    %25 = arith.mulf %23, %24 : vector<512x128xf32>
    %26 = arith.addf %20, %25 : vector<512x128xf32>
    %c0_3 = arith.constant 0 : index
    %c0_4 = arith.constant 0 : index
    %27 = vector.load %arg3[%c0_3, %c0_4] : memref<512x128xf32, #tpu.memory_space<vmem>>, vector<512x128xf32>
    tpu.vector_store %arg3[%c0_3, %c0_4], %26 {strides = array<i32>} : memref<512x128xf32, #tpu.memory_space<vmem>>, vector<512x128xf32>,
    return
  }
  func.func @transform_0(%arg0: i32) -> (i32, i32) {
    %c0_i32 = arith.constant 0 : i32
    %c0_i32_0 = arith.constant 0 : i32
    return %arg0, %c0_i32 : i32, i32
  }
  func.func @transform_1(%arg0: i32) -> (i32, i32) {
    %c0_i32 = arith.constant 0 : i32
    %c0_i32_0 = arith.constant 0 : i32
    %c0_i32_1 = arith.constant 0 : i32
    return %c0_i32, %c0_i32_0 : i32, i32
  }
  func.func @transform_2(%arg0: i32) -> (i32, i32) {
    %c0_i32 = arith.constant 0 : i32
    %c0_i32_0 = arith.constant 0 : i32
    return %arg0, %c0_i32 : i32, i32
  }
}

module attributes {stable_mosaic.version = 11 : i64} {
  func.func @_stats_kernel(%arg0: i32, %arg1: i32, %arg2: memref<64x128xf32, #tpu.memory_space<vmem>>, %arg3: memref<1x1x128xf32, #tpu.memory_space<vmem>>, %arg4: memref<1x1x128xf32, #tpu.memory_space<vmem>>) attributes {dimension_semantics = [#tpu.dimension_semantics<parallel>, #tpu.dimension_semantics<arbitrary>], iteration_bounds = array<i64: 2, 1>, scalar_prefetch = 0 : i64, scratch_operands = 0 : i64, tpu.core_type = #tpu.core_type<tc>, window_params = [{transform_indices = @transform_0, window_bounds = array<i64: 64, 128>}, {transform_indices = @transform_1, window_bounds = array<i64: 1, 1, 128>}, {transform_indices = @transform_2, window_bounds = array<i64: 1, 1, 128>}]} {
    %c0_i32 = arith.constant 0 : i32
    %0 = arith.cmpi eq, %arg1, %c0_i32 : i32
    %1 = arith.extui %0 : i1 to i32
    %c0_i32_0 = arith.constant 0 : i32
    %2 = arith.cmpi ne, %1, %c0_i32_0 : i32
    scf.if %2 {
      %cst_15 = arith.constant 0.000000e+00 : f32
      %17 = vector.broadcast %cst_15 : f32 to vector<1x1x128xf32>
      %c0_16 = arith.constant 0 : index
      %c0_17 = arith.constant 0 : index
      %c0_18 = arith.constant 0 : index
      %18 = vector.load %arg3[%c0_16, %c0_17, %c0_18] : memref<1x1x128xf32, #tpu.memory_space<vmem>>, vector<1x1x128xf32>
      tpu.vector_store %arg3[%c0_16, %c0_17, %c0_18], %17 {strides = array<i32>} : memref<1x1x128xf32, #tpu.memory_space<vmem>>, vector<1x1x128xf32>,
      %cst_19 = arith.constant 0.000000e+00 : f32
      %19 = vector.broadcast %cst_19 : f32 to vector<1x1x128xf32>
      %c0_20 = arith.constant 0 : index
      %c0_21 = arith.constant 0 : index
      %c0_22 = arith.constant 0 : index
      %20 = vector.load %arg4[%c0_20, %c0_21, %c0_22] : memref<1x1x128xf32, #tpu.memory_space<vmem>>, vector<1x1x128xf32>
      tpu.vector_store %arg4[%c0_20, %c0_21, %c0_22], %19 {strides = array<i32>} : memref<1x1x128xf32, #tpu.memory_space<vmem>>, vector<1x1x128xf32>,
    } else {
    }
    %c0 = arith.constant 0 : index
    %c0_1 = arith.constant 0 : index
    %3 = vector.load %arg2[%c0, %c0_1] : memref<64x128xf32, #tpu.memory_space<vmem>>, vector<64x128xf32>
    %c0_2 = arith.constant 0 : index
    %c0_3 = arith.constant 0 : index
    %c0_4 = arith.constant 0 : index
    %4 = vector.load %arg3[%c0_2, %c0_3, %c0_4] : memref<1x1x128xf32, #tpu.memory_space<vmem>>, vector<1x1x128xf32>
    %cst = arith.constant dense<0.000000e+00> : vector<128xf32>
    %5 = vector.multi_reduction <add>, %3, %cst [0] : vector<64x128xf32> to vector<128xf32>
    %6 = vector.shape_cast %5 : vector<128xf32> to vector<1x128xf32>
    %7 = vector.shape_cast %6 : vector<1x128xf32> to vector<1x1x128xf32>
    %8 = arith.addf %4, %7 : vector<1x1x128xf32>
    %c0_5 = arith.constant 0 : index
    %c0_6 = arith.constant 0 : index
    %c0_7 = arith.constant 0 : index
    %9 = vector.load %arg3[%c0_5, %c0_6, %c0_7] : memref<1x1x128xf32, #tpu.memory_space<vmem>>, vector<1x1x128xf32>
    tpu.vector_store %arg3[%c0_5, %c0_6, %c0_7], %8 {strides = array<i32>} : memref<1x1x128xf32, #tpu.memory_space<vmem>>, vector<1x1x128xf32>,
    %c0_8 = arith.constant 0 : index
    %c0_9 = arith.constant 0 : index
    %c0_10 = arith.constant 0 : index
    %10 = vector.load %arg4[%c0_8, %c0_9, %c0_10] : memref<1x1x128xf32, #tpu.memory_space<vmem>>, vector<1x1x128xf32>
    %11 = arith.mulf %3, %3 : vector<64x128xf32>
    %cst_11 = arith.constant dense<0.000000e+00> : vector<128xf32>
    %12 = vector.multi_reduction <add>, %11, %cst_11 [0] : vector<64x128xf32> to vector<128xf32>
    %13 = vector.shape_cast %12 : vector<128xf32> to vector<1x128xf32>
    %14 = vector.shape_cast %13 : vector<1x128xf32> to vector<1x1x128xf32>
    %15 = arith.addf %10, %14 : vector<1x1x128xf32>
    %c0_12 = arith.constant 0 : index
    %c0_13 = arith.constant 0 : index
    %c0_14 = arith.constant 0 : index
    %16 = vector.load %arg4[%c0_12, %c0_13, %c0_14] : memref<1x1x128xf32, #tpu.memory_space<vmem>>, vector<1x1x128xf32>
    tpu.vector_store %arg4[%c0_12, %c0_13, %c0_14], %15 {strides = array<i32>} : memref<1x1x128xf32, #tpu.memory_space<vmem>>, vector<1x1x128xf32>,
    return
  }
  func.func @transform_0(%arg0: i32, %arg1: i32) -> (i32, i32) {
    %c1_i32 = arith.constant 1 : i32
    %0 = arith.muli %arg0, %c1_i32 : i32
    %1 = arith.addi %0, %arg1 : i32
    %c0_i32 = arith.constant 0 : i32
    %c0_i32_0 = arith.constant 0 : i32
    return %1, %c0_i32 : i32, i32
  }
  func.func @transform_1(%arg0: i32, %arg1: i32) -> (i32, i32, i32) {
    %c0_i32 = arith.constant 0 : i32
    %c0_i32_0 = arith.constant 0 : i32
    %c0_i32_1 = arith.constant 0 : i32
    return %arg0, %c0_i32, %c0_i32_0 : i32, i32, i32
  }
  func.func @transform_2(%arg0: i32, %arg1: i32) -> (i32, i32, i32) {
    %c0_i32 = arith.constant 0 : i32
    %c0_i32_0 = arith.constant 0 : i32
    %c0_i32_1 = arith.constant 0 : i32
    return %arg0, %c0_i32, %c0_i32_0 : i32, i32, i32
  }
}

module attributes {stable_mosaic.version = 11 : i64} {
  func.func @_affine_kernel(%arg0: i32, %arg1: memref<64x128xf32, #tpu.memory_space<vmem>>, %arg2: memref<1x128xf32, #tpu.memory_space<vmem>>, %arg3: memref<1x128xf32, #tpu.memory_space<vmem>>, %arg4: memref<64x128xf32, #tpu.memory_space<vmem>>) attributes {dimension_semantics = [#tpu.dimension_semantics<parallel>], iteration_bounds = array<i64: 2>, scalar_prefetch = 0 : i64, scratch_operands = 0 : i64, tpu.core_type = #tpu.core_type<tc>, window_params = [{transform_indices = @transform_0, window_bounds = array<i64: 64, 128>}, {pipeline_mode = #tpu.pipeline_mode<synchronous>, transform_indices = @transform_1, window_bounds = array<i64: 1, 128>}, {pipeline_mode = #tpu.pipeline_mode<synchronous>, transform_indices = @transform_2, window_bounds = array<i64: 1, 128>}, {transform_indices = @transform_3, window_bounds = array<i64: 64, 128>}]} {
    %c0 = arith.constant 0 : index
    %c0_0 = arith.constant 0 : index
    %0 = vector.load %arg1[%c0, %c0_0] : memref<64x128xf32, #tpu.memory_space<vmem>>, vector<64x128xf32>
    %c0_1 = arith.constant 0 : index
    %c0_2 = arith.constant 0 : index
    %1 = vector.load %arg2[%c0_1, %c0_2] : memref<1x128xf32, #tpu.memory_space<vmem>>, vector<1x128xf32>
    %2 = vector.broadcast %1 : vector<1x128xf32> to vector<64x128xf32>
    %3 = arith.mulf %0, %2 : vector<64x128xf32>
    %c0_3 = arith.constant 0 : index
    %c0_4 = arith.constant 0 : index
    %4 = vector.load %arg3[%c0_3, %c0_4] : memref<1x128xf32, #tpu.memory_space<vmem>>, vector<1x128xf32>
    %5 = vector.broadcast %4 : vector<1x128xf32> to vector<64x128xf32>
    %6 = arith.addf %3, %5 : vector<64x128xf32>
    %c0_5 = arith.constant 0 : index
    %c0_6 = arith.constant 0 : index
    %7 = vector.load %arg4[%c0_5, %c0_6] : memref<64x128xf32, #tpu.memory_space<vmem>>, vector<64x128xf32>
    tpu.vector_store %arg4[%c0_5, %c0_6], %6 {strides = array<i32>} : memref<64x128xf32, #tpu.memory_space<vmem>>, vector<64x128xf32>,
    return
  }
  func.func @transform_0(%arg0: i32) -> (i32, i32) {
    %c0_i32 = arith.constant 0 : i32
    %c0_i32_0 = arith.constant 0 : i32
    return %arg0, %c0_i32 : i32, i32
  }
  func.func @transform_1(%arg0: i32) -> (i32, i32) {
    %c0_i32 = arith.constant 0 : i32
    %c0_i32_0 = arith.constant 0 : i32
    %c0_i32_1 = arith.constant 0 : i32
    return %c0_i32, %c0_i32_0 : i32, i32
  }
  func.func @transform_2(%arg0: i32) -> (i32, i32) {
    %c0_i32 = arith.constant 0 : i32
    %c0_i32_0 = arith.constant 0 : i32
    %c0_i32_1 = arith.constant 0 : i32
    return %c0_i32, %c0_i32_0 : i32, i32
  }
  func.func @transform_3(%arg0: i32) -> (i32, i32) {
    %c0_i32 = arith.constant 0 : i32
    %c0_i32_0 = arith.constant 0 : i32
    return %arg0, %c0_i32 : i32, i32
  }
}

</mosaic_0001>

<bundles_post_ra>
// kernel: deconv_block.3
= control target key start
LH: loop header
LB: loop body
LE: loop exit
PB: predicated region body
PF: predicated region fallthrough
CT: control target
= control target key end

     0   :  { %v1772_v0 = vmov 0   ;;  %s3402_s0 = inlined_call_operand.vmem [shape: f32[512,4], index: 0, kind: input, shape index: {}]   ;;  %s3403_s1 = inlined_call_operand.vmem [shape: f32[4,128], index: 1, kind: input, shape index: {}]   ;;  %s3404_s2 = inlined_call_operand.vmem [shape: f32[512,128], index: 2, kind: output, shape index: {}]  }
   0x1   :  { %1765 = vset.pattern.permute.xlu1 %v1772_v0  ;;  %1764 = vset.pattern.permute.xlu0 %v1772_v0  ;;  %v13_v1 = vld [vmem:[%s3402_s0 + $0x10] sm:$0xff]  ;;  %v11_v2 = vld [vmem:[%s3402_s0] sm:$0xff]  ;;  %v14_v3 = vld [vmem:[%s3402_s0 + $0x18] sm:$0xff] }
   0x2   :  { %v1800_v4 = vmax.f32 %v13_v1, 0.0  ;;  %v1802_v5 = vmax.f32 %v11_v2, 0.0  ;;  %v12_v6 = vld [vmem:[%s3402_s0 + $0x8] sm:$0xff]  ;;  %v1809_v7 = vmax.f32 %v14_v3, 0.0  ;;  %v15_v10 = vld [vmem:[%s3402_s0 + $0x20] sm:$0xff]  ;;  %v18_v13 = vld [vmem:[%s3402_s0 + $0x38] sm:$0xff] }
   0x3   :  { %v1811_v8 = vmax.f32 %v12_v6, 0.0  ;;  %v16_v9 = vld [vmem:[%s3402_s0 + $0x28] sm:$0xff]  ;;  %v1823_v12 = vmax.f32 %v15_v10, 0.0  ;;  %v17_v14 = vld [vmem:[%s3402_s0 + $0x30] sm:$0xff]  ;;  %v1833_v15 = vmax.f32 %v18_v13, 0.0  ;;  %v19_v18 = vld [vmem:[%s3402_s0 + $0x40] sm:$0xff] }
   0x4   :  { %152 = vperm.xlu1 %1765, %v1800_v4   ;;  %142 = vperm.xlu0 %1764, %v1802_v5   ;;  %v1821_v11 = vmax.f32 %v16_v9, 0.0  ;;  %v1835_v16 = vmax.f32 %v17_v14, 0.0  ;;  %v20_v17 = vld [vmem:[%s3402_s0 + $0x48] sm:$0xff]  ;;  %v1847_v20 = vmax.f32 %v19_v18, 0.0  ;;  %v22_v21 = vld [vmem:[%s3402_s0 + $0x58] sm:$0xff]  ;;  %v21_v22 = vld [vmem:[%s3402_s0 + $0x50] sm:$0xff] }
   0x5   :  { %v1845_v19 = vmax.f32 %v20_v17, 0.0  ;;  %v1857_v23 = vmax.f32 %v22_v21, 0.0  ;;  %v1859_v24 = vmax.f32 %v21_v22, 0.0  ;;  %v24_v25 = vld [vmem:[%s3402_s0 + $0x68] sm:$0xff]  ;;  %v23_v26 = vld [vmem:[%s3402_s0 + $0x60] sm:$0xff]  ;;  %v26_v29 = vld [vmem:[%s3402_s0 + $0x78] sm:$0xff] }
   0x6   :  { %v1869_v27 = vmax.f32 %v24_v25, 0.0  ;;  %v1871_v28 = vmax.f32 %v23_v26, 0.0  ;;  %v25_v30 = vld [vmem:[%s3402_s0 + $0x70] sm:$0xff]  ;;  %v1881_v31 = vmax.f32 %v26_v29, 0.0  ;;  %v28_v33 = vld [vmem:[%s3402_s0 + $0x88] sm:$0xff]  ;;  %v27_v34 = vld [vmem:[%s3402_s0 + $0x80] sm:$0xff] }
   0x7   :  { %v1883_v32 = vmax.f32 %v25_v30, 0.0  ;;  %v1893_v35 = vmax.f32 %v28_v33, 0.0  ;;  %v1895_v36 = vmax.f32 %v27_v34, 0.0  ;;  %v30_v37 = vld [vmem:[%s3402_s0 + $0x98] sm:$0xff]  ;;  %v29_v38 = vld [vmem:[%s3402_s0 + $0x90] sm:$0xff]  ;;  %v32_v41 = vld [vmem:[%s3402_s0 + $0xa8] sm:$0xff] }
   0x8   :  { %157 = vperm.xlu1 %1765, %v1809_v7   ;;  %147 = vperm.xlu0 %1764, %v1811_v8   ;;  %v1905_v39 = vmax.f32 %v30_v37, 0.0  ;;  %v1907_v40 = vmax.f32 %v29_v38, 0.0  ;;  %v31_v42 = vld [vmem:[%s3402_s0 + $0xa0] sm:$0xff]  ;;  %v1917_v43 = vmax.f32 %v32_v41, 0.0  ;;  %v34_v45 = vld [vmem:[%s3402_s0 + $0xb8] sm:$0xff]  ;;  %v33_v46 = vld [vmem:[%s3402_s0 + $0xb0] sm:$0xff] }
   0x9   :  { %v1919_v44 = vmax.f32 %v31_v42, 0.0  ;;  %v1929_v47 = vmax.f32 %v34_v45, 0.0  ;;  %v1931_v48 = vmax.f32 %v33_v46, 0.0  ;;  %v36_v49 = vld [vmem:[%s3402_s0 + $0xc8] sm:$0xff]  ;;  %v35_v50 = vld [vmem:[%s3402_s0 + $0xc0] sm:$0xff]  ;;  %v38_v53 = vld [vmem:[%s3402_s0 + $0xd8] sm:$0xff] }
   0xa   :  { %v1941_v51 = vmax.f32 %v36_v49, 0.0  ;;  %v1943_v52 = vmax.f32 %v35_v50, 0.0  ;;  %v37_v54 = vld [vmem:[%s3402_s0 + $0xd0] sm:$0xff]  ;;  %v1953_v55 = vmax.f32 %v38_v53, 0.0  ;;  %v40_v57 = vld [vmem:[%s3402_s0 + $0xe8] sm:$0xff]  ;;  %v39_v58 = vld [vmem:[%s3402_s0 + $0xe0] sm:$0xff] }
   0xb   :  { %v1955_v56 = vmax.f32 %v37_v54, 0.0  ;;  %v1965_v59 = vmax.f32 %v40_v57, 0.0  ;;  %v1967_v60 = vmax.f32 %v39_v58, 0.0  ;;  %v42_v61 = vld [vmem:[%s3402_s0 + $0xf8] sm:$0xff]  ;;  %v41_v62 = vld [vmem:[%s3402_s0 + $0xf0] sm:$0xff]  ;;  %v44_v1 = vld [vmem:[%s3402_s0 + $0x108] sm:$0xff] }
   0xc   :  { %167 = vperm.xlu1 %1765, %v1821_v11   ;;  %162 = vperm.xlu0 %1764, %v1823_v12   ;;  %v1977_v63 = vmax.f32 %v42_v61, 0.0  ;;  %v1979_v0 = vmax.f32 %v41_v62, 0.0  ;;  %v43_v2 = vld [vmem:[%s3402_s0 + $0x100] sm:$0xff]  ;;  %v1989_v3 = vmax.f32 %v44_v1, 0.0  ;;  %v46_v9 = vld [vmem:[%s3402_s0 + $0x118] sm:$0xff]  ;;  %v45_v10 = vld [vmem:[%s3402_s0 + $0x110] sm:$0xff] }
   0xd   :  { %v1991_v6 = vmax.f32 %v43_v2, 0.0  ;;  %v2001_v13 = vmax.f32 %v46_v9, 0.0  ;;  %v2003_v14 = vmax.f32 %v45_v10, 0.0  ;;  %v48_v17 = vld [vmem:[%s3402_s0 + $0x128] sm:$0xff]  ;;  %v47_v18 = vld [vmem:[%s3402_s0 + $0x120] sm:$0xff]  ;;  %v50_v25 = vld [vmem:[%s3402_s0 + $0x138] sm:$0xff] }
   0xe   :  { %v2013_v21 = vmax.f32 %v48_v17, 0.0  ;;  %v2015_v22 = vmax.f32 %v47_v18, 0.0  ;;  %v49_v26 = vld [vmem:[%s3402_s0 + $0x130] sm:$0xff]  ;;  %v2025_v29 = vmax.f32 %v50_v25, 0.0  ;;  %v52_v33 = vld [vmem:[%s3402_s0 + $0x148] sm:$0xff]  ;;  %v51_v34 = vld [vmem:[%s3402_s0 + $0x140] sm:$0xff] }
   0xf   :  { %v2027_v30 = vmax.f32 %v49_v26, 0.0  ;;  %v2037_v37 = vmax.f32 %v52_v33, 0.0  ;;  %v2039_v38 = vmax.f32 %v51_v34, 0.0  ;;  %v54_v41 = vld [vmem:[%s3402_s0 + $0x158] sm:$0xff]  ;;  %v53_v42 = vld [vmem:[%s3402_s0 + $0x150] sm:$0xff]  ;;  %v56_v49 = vld [vmem:[%s3402_s0 + $0x168] sm:$0xff] }
  0x10   :  { %177 = vperm.xlu1 %1765, %v1833_v15   ;;  %172 = vperm.xlu0 %1764, %v1835_v16   ;;  %v2049_v45 = vmax.f32 %v54_v41, 0.0  ;;  %v2051_v46 = vmax.f32 %v53_v42, 0.0  ;;  %v55_v50 = vld [vmem:[%s3402_s0 + $0x160] sm:$0xff]  ;;  %v2061_v53 = vmax.f32 %v56_v49, 0.0  ;;  %v58_v57 = vld [vmem:[%s3402_s0 + $0x178] sm:$0xff]  ;;  %v57_v58 = vld [vmem:[%s3402_s0 + $0x170] sm:$0xff] }
  0x11   :  { %v2063_v54 = vmax.f32 %v55_v50, 0.0  ;;  %v2073_v61 = vmax.f32 %v58_v57, 0.0  ;;  %v2075_v62 = vmax.f32 %v57_v58, 0.0  ;;  %v60_v1 = vld [vmem:[%s3402_s0 + $0x188] sm:$0xff]  ;;  %v59_v2 = vld [vmem:[%s3402_s0 + $0x180] sm:$0xff]  ;;  %v62_v17 = vld [vmem:[%s3402_s0 + $0x198] sm:$0xff] }
  0x12   :  { %v2085_v9 = vmax.f32 %v60_v1, 0.0  ;;  %v2087_v10 = vmax.f32 %v59_v2, 0.0  ;;  %v61_v18 = vld [vmem:[%s3402_s0 + $0x190] sm:$0xff]  ;;  %v2097_v25 = vmax.f32 %v62_v17, 0.0  ;;  %v64_v33 = vld [vmem:[%s3402_s0 + $0x1a8] sm:$0xff]  ;;  %v63_v34 = vld [vmem:[%s3402_s0 + $0x1a0] sm:$0xff] }
  0x13   :  { %3434 = vst [vmem:[#allocation2_spill] sm:$0xff] %v2063_v54  ;;  %3435 = vst [vmem:[#allocation3_spill] sm:$0xff] %v2073_v61  ;;  %v2099_v26 = vmax.f32 %v61_v18, 0.0  ;;  %v2109_v41 = vmax.f32 %v64_v33, 0.0  ;;  %v2111_v42 = vmax.f32 %v63_v34, 0.0  ;;  %v66_v49 = vld [vmem:[%s3402_s0 + $0x1b8] sm:$0xff] }
  0x14   :  { %187 = vperm.xlu1 %1765, %v1845_v19   ;;  %182 = vperm.xlu0 %1764, %v1847_v20   ;;  %3436 = vst [vmem:[#allocation4_spill] sm:$0xff] %v2075_v62  ;;  %3437 = vst [vmem:[#allocation5_spill] sm:$0xff] %v2085_v9  ;;  %v65_v50 = vld [vmem:[%s3402_s0 + $0x1b0] sm:$0xff]  ;;  %v2121_v57 = vmax.f32 %v66_v49, 0.0  ;;  %v68_v1 = vld [vmem:[%s3402_s0 + $0x1c8] sm:$0xff] }
  0x15   :  { %3438 = vst [vmem:[#allocation6_spill] sm:$0xff] %v2087_v10  ;;  %3439 = vst [vmem:[#allocation7_spill] sm:$0xff] %v2097_v25  ;;  %v2123_v58 = vmax.f32 %v65_v50, 0.0  ;;  %v67_v2 = vld [vmem:[%s3402_s0 + $0x1c0] sm:$0xff]  ;;  %v2133_v17 = vmax.f32 %v68_v1, 0.0  ;;  %v70_v33 = vld [vmem:[%s3402_s0 + $0x1d8] sm:$0xff] }
  0x16   :  { %3440 = vst [vmem:[#allocation8_spill] sm:$0xff] %v2099_v26  ;;  %3441 = vst [vmem:[#allocation9_spill] sm:$0xff] %v2109_v41  ;;  %v2135_v18 = vmax.f32 %v67_v2, 0.0  ;;  %v69_v34 = vld [vmem:[%s3402_s0 + $0x1d0] sm:$0xff]  ;;  %v2145_v49 = vmax.f32 %v70_v33, 0.0  ;;  %v72_v1 = vld [vmem:[%s3402_s0 + $0x1e8] sm:$0xff] }
  0x17   :  { %3442 = vst [vmem:[#allocation10_spill] sm:$0xff] %v2111_v42  ;;  %3443 = vst [vmem:[#allocation11_spill] sm:$0xff] %v2121_v57  ;;  %v2147_v50 = vmax.f32 %v69_v34, 0.0  ;;  %v71_v2 = vld [vmem:[%s3402_s0 + $0x1e0] sm:$0xff]  ;;  %v74_v33 = vld [vmem:[%s3402_s0 + $0x1f8] sm:$0xff] }
  0x18   :  { %197 = vperm.xlu1 %1765, %v1857_v23   ;;  %192 = vperm.xlu0 %1764, %v1859_v24   ;;  %3444 = vst [vmem:[#allocation12_spill] sm:$0xff] %v2123_v58  ;;  %3445 = vst [vmem:[#allocation13_spill] sm:$0xff] %v2133_v17  ;;  %v73_v34 = vld [vmem:[%s3402_s0 + $0x1f0] sm:$0xff] }
  0x19   :  { %3446 = vst [vmem:[#allocation14_spill] sm:$0xff] %v2135_v18  ;;  %3447 = vst [vmem:[#allocation15_spill] sm:$0xff] %v2145_v49 }
  0x1a   :  { %3448 = vst [vmem:[#allocation16_spill] sm:$0xff] %v2147_v50 }
  0x1c   :  { %207 = vperm.xlu1 %1765, %v1869_v27   ;;  %202 = vperm.xlu0 %1764, %v1871_v28  }
  0x20   :  { %217 = vperm.xlu1 %1765, %v1881_v31   ;;  %212 = vperm.xlu0 %1764, %v1883_v32  }
  0x24   :  { %227 = vperm.xlu1 %1765, %v1893_v35   ;;  %222 = vperm.xlu0 %1764, %v1895_v36  }
  0x28   :  { %237 = vperm.xlu1 %1765, %v1905_v39   ;;  %232 = vperm.xlu0 %1764, %v1907_v40  }
  0x2c   :  { %247 = vperm.xlu1 %1765, %v1917_v43   ;;  %242 = vperm.xlu0 %1764, %v1919_v44  }
  0x30   :  { %257 = vperm.xlu1 %1765, %v1929_v47   ;;  %252 = vperm.xlu0 %1764, %v1931_v48  }
  0x34   :  { %267 = vperm.xlu1 %1765, %v1941_v51   ;;  %262 = vperm.xlu0 %1764, %v1943_v52  }
  0x38   :  { %277 = vperm.xlu1 %1765, %v1953_v55   ;;  %272 = vperm.xlu0 %1764, %v1955_v56  }
  0x3c   :  { %287 = vperm.xlu1 %1765, %v1965_v59   ;;  %282 = vperm.xlu0 %1764, %v1967_v60  }
  0x40   :  { %297 = vperm.xlu1 %1765, %v1977_v63   ;;  %292 = vperm.xlu0 %1764, %v1979_v0  }
  0x44   :  { %307 = vperm.xlu1 %1765, %v1989_v3   ;;  %302 = vperm.xlu0 %1764, %v1991_v6  }
  0x48   :  { %317 = vperm.xlu1 %1765, %v2001_v13   ;;  %312 = vperm.xlu0 %1764, %v2003_v14  }
  0x4c   :  { %327 = vperm.xlu1 %1765, %v2013_v21   ;;  %322 = vperm.xlu0 %1764, %v2015_v22  }
  0x50   :  { %337 = vperm.xlu1 %1765, %v2025_v29   ;;  %332 = vperm.xlu0 %1764, %v2027_v30  }
  0x54   :  { %347 = vperm.xlu1 %1765, %v2037_v37   ;;  %342 = vperm.xlu0 %1764, %v2039_v38  }
  0x58   :  { %357 = vperm.xlu1 %1765, %v2049_v45   ;;  %352 = vperm.xlu0 %1764, %v2051_v46  }
  0x5c   :  { %367 = vperm.xlu1 %1765, %v2061_v53   ;;  %362 = vperm.xlu0 %1764, %v2063_v54  }
  0x60   :  { %377 = vperm.xlu1 %1765, %v2073_v61   ;;  %372 = vperm.xlu0 %1764, %v2075_v62  }
  0x64   :  { %387 = vperm.xlu1 %1765, %v2085_v9   ;;  %382 = vperm.xlu0 %1764, %v2087_v10  }
  0x68   :  { %397 = vperm.xlu1 %1765, %v2097_v25   ;;  %392 = vperm.xlu0 %1764, %v2099_v26  }
  0x6c   :  { %407 = vperm.xlu1 %1765, %v2109_v41   ;;  %402 = vperm.xlu0 %1764, %v2111_v42   ;;  %v1773_v41 = vmov 1  }
  0x70   :  { %417 = vperm.xlu1 %1765, %v2121_v57   ;;  %412 = vperm.xlu0 %1764, %v2123_v58   ;;  %v2157_v57 = vmax.f32 %v72_v1, 0.0 }
  0x74   :  { %427 = vperm.xlu1 %1765, %v2133_v17   ;;  %422 = vperm.xlu0 %1764, %v2135_v18   ;;  %v2159_v17 = vmax.f32 %v71_v2, 0.0  ;;  %v2169_v18 = vmax.f32 %v74_v33, 0.0 }
  0x76   :  { %3449 = vst [vmem:[#allocation17_spill] sm:$0xff] %v2159_v17 }
  0x78   :  { %437 = vperm.xlu1 %1765, %v2145_v49   ;;  %432 = vperm.xlu0 %1764, %v2147_v50   ;;  %v2171_v49 = vmax.f32 %v73_v34, 0.0 }
  0x7a   :  { %3450 = vst [vmem:[#allocation18_spill] sm:$0xff] %v2171_v49 }
  0x7c   :  { %447 = vperm.xlu1 %1765, %v2157_v57   ;;  %442 = vperm.xlu0 %1764, %v2159_v17  }
  0x7f   :  { %v2173_v1 = vpop.permute.xlu1 %152  ;;  %v2175_v2 = vpop.permute.xlu0 %142 }
  0x80   :  { %3451 = vst [vmem:[#allocation19_spill] sm:$0xff] %v2173_v1  ;;  %3452 = vst [vmem:[#allocation20_spill] sm:$0xff] %v2175_v2  ;;  %457 = vperm.xlu1 %1765, %v2169_v18   ;;  %452 = vperm.xlu0 %1764, %v2171_v49  }
  0x83   :  { %v2179_v50 = vpop.permute.xlu1 %157  ;;  %v2181_v58 = vpop.permute.xlu0 %147 }
  0x84   :  { %3453 = vst [vmem:[#allocation21_spill] sm:$0xff] %v2179_v50  ;;  %3454 = vst [vmem:[#allocation22_spill] sm:$0xff] %v2181_v58  ;;  %1767 = vset.pattern.permute.xlu1 %v1773_v41  ;;  %1766 = vset.pattern.permute.xlu0 %v1773_v41 }
  0x85   :  { %533 = vperm.xlu1 %1767, %v1811_v8   ;;  %529 = vperm.xlu0 %1766, %v1802_v5  }
  0x87   :  { %v2185_v33 = vpop.permute.xlu1 %167  ;;  %v2187_v34 = vpop.permute.xlu0 %162 }
  0x88   :  { %3455 = vst [vmem:[#allocation23_spill] sm:$0xff] %v2185_v33  ;;  %3456 = vst [vmem:[#allocation24_spill] sm:$0xff] %v2187_v34 }
  0x89   :  { %537 = vperm.xlu1 %1767, %v1800_v4   ;;  %541 = vperm.xlu0 %1766, %v1809_v7  }
  0x8b   :  { %v2191_v1 = vpop.permute.xlu1 %177  ;;  %v2193_v50 = vpop.permute.xlu0 %172 }
  0x8c   :  { %3457 = vst [vmem:[#allocation25_spill] sm:$0xff] %v2191_v1  ;;  %3458 = vst [vmem:[#allocation26_spill] sm:$0xff] %v2193_v50 }
  0x8d   :  { %545 = vperm.xlu1 %1767, %v1823_v12   ;;  %549 = vperm.xlu0 %1766, %v1821_v11  }
  0x8f   :  { %v2197_v41 = vpop.permute.xlu1 %187  ;;  %v2199_v58 = vpop.permute.xlu0 %182 }
  0x90   :  { %3459 = vst [vmem:[#allocation27_spill] sm:$0xff] %v2197_v41  ;;  %3460 = vst [vmem:[#allocation28_spill] sm:$0xff] %v2199_v58 }
  0x91   :  { %553 = vperm.xlu1 %1767, %v1835_v16   ;;  %557 = vperm.xlu0 %1766, %v1833_v15  }
  0x93   :  { %v2203_v34 = vpop.permute.xlu1 %197  ;;  %v2205_v33 = vpop.permute.xlu0 %192 }
  0x94   :  { %3461 = vst [vmem:[#allocation29_spill] sm:$0xff] %v2203_v34  ;;  %3462 = vst [vmem:[#allocation30_spill] sm:$0xff] %v2205_v33 }
  0x95   :  { %561 = vperm.xlu1 %1767, %v1847_v20   ;;  %565 = vperm.xlu0 %1766, %v1845_v19  }
  0x97   :  { %v2209_v50 = vpop.permute.xlu1 %207  ;;  %v2211_v1 = vpop.permute.xlu0 %202 }
  0x98   :  { %3463 = vst [vmem:[#allocation31_spill] sm:$0xff] %v2209_v50  ;;  %3464 = vst [vmem:[#allocation32_spill] sm:$0xff] %v2211_v1 }
  0x99   :  { %569 = vperm.xlu1 %1767, %v1859_v24   ;;  %573 = vperm.xlu0 %1766, %v1857_v23  }
  0x9b   :  { %v2215_v58 = vpop.permute.xlu1 %217  ;;  %v2217_v41 = vpop.permute.xlu0 %212 }
  0x9c   :  { %3465 = vst [vmem:[#allocation33_spill] sm:$0xff] %v2215_v58  ;;  %3466 = vst [vmem:[#allocation34_spill] sm:$0xff] %v2217_v41 }
  0x9d   :  { %577 = vperm.xlu1 %1767, %v1871_v28   ;;  %581 = vperm.xlu0 %1766, %v1869_v27  }
  0x9f   :  { %v2221_v33 = vpop.permute.xlu1 %227  ;;  %v2223_v34 = vpop.permute.xlu0 %222 }
  0xa0   :  { %3467 = vst [vmem:[#allocation35_spill] sm:$0xff] %v2221_v33  ;;  %3468 = vst [vmem:[#allocation36_spill] sm:$0xff] %v2223_v34 }
  0xa1   :  { %585 = vperm.xlu1 %1767, %v1883_v32   ;;  %589 = vperm.xlu0 %1766, %v1881_v31  }
  0xa3   :  { %v2227_v1 = vpop.permute.xlu1 %237  ;;  %v2229_v50 = vpop.permute.xlu0 %232 }
  0xa4   :  { %3469 = vst [vmem:[#allocation37_spill] sm:$0xff] %v2227_v1  ;;  %3470 = vst [vmem:[#allocation38_spill] sm:$0xff] %v2229_v50 }
  0xa5   :  { %593 = vperm.xlu1 %1767, %v1895_v36   ;;  %597 = vperm.xlu0 %1766, %v1893_v35  }
  0xa7   :  { %v2233_v41 = vpop.permute.xlu1 %247  ;;  %v2235_v58 = vpop.permute.xlu0 %242 }
  0xa8   :  { %3471 = vst [vmem:[#allocation39_spill] sm:$0xff] %v2233_v41  ;;  %3472 = vst [vmem:[#allocation40_spill] sm:$0xff] %v2235_v58 }
  0xa9   :  { %601 = vperm.xlu1 %1767, %v1907_v40   ;;  %605 = vperm.xlu0 %1766, %v1905_v39  }
  0xab   :  { %v2239_v34 = vpop.permute.xlu1 %257  ;;  %v2241_v33 = vpop.permute.xlu0 %252 }
  0xac   :  { %3473 = vst [vmem:[#allocation41_spill] sm:$0xff] %v2239_v34  ;;  %3474 = vst [vmem:[#allocation42_spill] sm:$0xff] %v2241_v33 }
  0xad   :  { %609 = vperm.xlu1 %1767, %v1919_v44   ;;  %613 = vperm.xlu0 %1766, %v1917_v43  }
  0xaf   :  { %v2245_v50 = vpop.permute.xlu1 %267  ;;  %v2247_v1 = vpop.permute.xlu0 %262 }
  0xb0   :  { %3475 = vst [vmem:[#allocation43_spill] sm:$0xff] %v2245_v50  ;;  %3476 = vst [vmem:[#allocation44_spill] sm:$0xff] %v2247_v1 }
  0xb1   :  { %617 = vperm.xlu1 %1767, %v1931_v48   ;;  %621 = vperm.xlu0 %1766, %v1929_v47  }
  0xb3   :  { %v2251_v58 = vpop.permute.xlu1 %277  ;;  %v2253_v41 = vpop.permute.xlu0 %272 }
  0xb4   :  { %3477 = vst [vmem:[#allocation45_spill] sm:$0xff] %v2251_v58  ;;  %3478 = vst [vmem:[#allocation46_spill] sm:$0xff] %v2253_v41 }
  0xb5   :  { %625 = vperm.xlu1 %1767, %v1943_v52   ;;  %629 = vperm.xlu0 %1766, %v1941_v51  }
  0xb7   :  { %v2257_v33 = vpop.permute.xlu1 %287  ;;  %v2259_v34 = vpop.permute.xlu0 %282 }
  0xb8   :  { %3479 = vst [vmem:[#allocation47_spill] sm:$0xff] %v2257_v33  ;;  %3480 = vst [vmem:[#allocation48_spill] sm:$0xff] %v2259_v34 }
  0xb9   :  { %633 = vperm.xlu1 %1767, %v1955_v56   ;;  %637 = vperm.xlu0 %1766, %v1953_v55  }
  0xbb   :  { %v2263_v1 = vpop.permute.xlu1 %297  ;;  %v2265_v50 = vpop.permute.xlu0 %292 }
  0xbc   :  { %3481 = vst [vmem:[#allocation49_spill] sm:$0xff] %v2263_v1  ;;  %3482 = vst [vmem:[#allocation50_spill] sm:$0xff] %v2265_v50 }
  0xbd   :  { %641 = vperm.xlu1 %1767, %v1967_v60   ;;  %645 = vperm.xlu0 %1766, %v1965_v59  }
  0xbf   :  { %v2269_v41 = vpop.permute.xlu1 %307  ;;  %v2271_v58 = vpop.permute.xlu0 %302 }
  0xc0   :  { %3483 = vst [vmem:[#allocation51_spill] sm:$0xff] %v2269_v41  ;;  %3484 = vst [vmem:[#allocation52_spill] sm:$0xff] %v2271_v58 }
  0xc1   :  { %649 = vperm.xlu1 %1767, %v1979_v0   ;;  %653 = vperm.xlu0 %1766, %v1977_v63  }
  0xc3   :  { %v2275_v34 = vpop.permute.xlu1 %317  ;;  %v2277_v33 = vpop.permute.xlu0 %312 }
  0xc4   :  { %3485 = vst [vmem:[#allocation53_spill] sm:$0xff] %v2275_v34  ;;  %3486 = vst [vmem:[#allocation54_spill] sm:$0xff] %v2277_v33 }
  0xc5   :  { %657 = vperm.xlu1 %1767, %v1991_v6   ;;  %661 = vperm.xlu0 %1766, %v1989_v3  }
  0xc7   :  { %v2281_v50 = vpop.permute.xlu1 %327  ;;  %v2283_v1 = vpop.permute.xlu0 %322 }
  0xc8   :  { %3487 = vst [vmem:[#allocation55_spill] sm:$0xff] %v2281_v50  ;;  %3488 = vst [vmem:[#allocation56_spill] sm:$0xff] %v2283_v1 }
  0xc9   :  { %665 = vperm.xlu1 %1767, %v2003_v14   ;;  %669 = vperm.xlu0 %1766, %v2001_v13  }
  0xcb   :  { %v2287_v58 = vpop.permute.xlu1 %337  ;;  %v2289_v41 = vpop.permute.xlu0 %332 }
  0xcc   :  { %3489 = vst [vmem:[#allocation57_spill] sm:$0xff] %v2287_v58  ;;  %3490 = vst [vmem:[#allocation58_spill] sm:$0xff] %v2289_v41 }
  0xcd   :  { %673 = vperm.xlu1 %1767, %v2015_v22   ;;  %677 = vperm.xlu0 %1766, %v2013_v21  }
  0xcf   :  { %v2293_v33 = vpop.permute.xlu1 %347  ;;  %v2295_v34 = vpop.permute.xlu0 %342 }
  0xd0   :  { %3491 = vst [vmem:[#allocation59_spill] sm:$0xff] %v2293_v33  ;;  %3492 = vst [vmem:[#allocation60_spill] sm:$0xff] %v2295_v34 }
  0xd1   :  { %681 = vperm.xlu1 %1767, %v2027_v30   ;;  %685 = vperm.xlu0 %1766, %v2025_v29  }
  0xd3   :  { %v2299_v1 = vpop.permute.xlu1 %357  ;;  %v2301_v50 = vpop.permute.xlu0 %352 }
  0xd4   :  { %3493 = vst [vmem:[#allocation61_spill] sm:$0xff] %v2299_v1  ;;  %3494 = vst [vmem:[#allocation62_spill] sm:$0xff] %v2301_v50 }
  0xd5   :  { %689 = vperm.xlu1 %1767, %v2039_v38   ;;  %693 = vperm.xlu0 %1766, %v2037_v37  }
  0xd7   :  { %v2305_v41 = vpop.permute.xlu1 %367  ;;  %v2307_v58 = vpop.permute.xlu0 %362 }
  0xd8   :  { %3495 = vst [vmem:[#allocation63_spill] sm:$0xff] %v2305_v41  ;;  %3496 = vst [vmem:[#allocation64_spill] sm:$0xff] %v2307_v58 }
  0xd9   :  { %697 = vperm.xlu1 %1767, %v2051_v46   ;;  %701 = vperm.xlu0 %1766, %v2049_v45  }
  0xdb   :  { %v2311_v34 = vpop.permute.xlu1 %377  ;;  %v2313_v33 = vpop.permute.xlu0 %372 }
  0xdc   :  { %3497 = vst [vmem:[#allocation65_spill] sm:$0xff] %v2311_v34  ;;  %3498 = vst [vmem:[#allocation66_spill] sm:$0xff] %v2313_v33 }
  0xdd   :  { %705 = vperm.xlu1 %1767, %v2063_v54   ;;  %709 = vperm.xlu0 %1766, %v2061_v53  }
  0xdf   :  { %v2317_v50 = vpop.permute.xlu1 %387  ;;  %v2319_v1 = vpop.permute.xlu0 %382 }
  0xe0   :  { %3499 = vst [vmem:[#allocation67_spill] sm:$0xff] %v2317_v50  ;;  %3500 = vst [vmem:[#allocation68_spill] sm:$0xff] %v2319_v1 }
  0xe1   :  { %713 = vperm.xlu1 %1767, %v2075_v62   ;;  %717 = vperm.xlu0 %1766, %v2073_v61  }
  0xe3   :  { %v2323_v58 = vpop.permute.xlu1 %397  ;;  %v2325_v41 = vpop.permute.xlu0 %392 }
  0xe4   :  { %3501 = vst [vmem:[#allocation69_spill] sm:$0xff] %v2323_v58  ;;  %3502 = vst [vmem:[#allocation70_spill] sm:$0xff] %v2325_v41  ;;  %v3507_v58 = vld [vmem:[#allocation9_spill] sm:$0xff] }
  0xe5   :  { %721 = vperm.xlu1 %1767, %v2087_v10   ;;  %725 = vperm.xlu0 %1766, %v2085_v9   ;;  %v3510_v9 = vld [vmem:[#allocation12_spill] sm:$0xff] }
  0xe7   :  { %v2329_v33 = vpop.permute.xlu1 %407  ;;  %v2331_v34 = vpop.permute.xlu0 %402 }
  0xe8   :  { %3503 = vst [vmem:[#allocation71_spill] sm:$0xff] %v2329_v33  ;;  %3504 = vst [vmem:[#allocation72_spill] sm:$0xff] %v2331_v34  ;;  %v3511_v33 = vld [vmem:[#allocation11_spill] sm:$0xff] }
  0xe9   :  { %729 = vperm.xlu1 %1767, %v2099_v26   ;;  %733 = vperm.xlu0 %1766, %v2097_v25   ;;  %v3514_v25 = vld [vmem:[#allocation14_spill] sm:$0xff] }
  0xeb   :  { %v2335_v1 = vpop.permute.xlu1 %417  ;;  %v2337_v50 = vpop.permute.xlu0 %412 }
  0xec   :  { %3505 = vst [vmem:[#allocation73_spill] sm:$0xff] %v2335_v1  ;;  %3506 = vst [vmem:[#allocation74_spill] sm:$0xff] %v2337_v50  ;;  %v3515_v1 = vld [vmem:[#allocation13_spill] sm:$0xff] }
  0xed   :  { %737 = vperm.xlu1 %1767, %v2111_v42   ;;  %741 = vperm.xlu0 %1766, %v3507_v58   ;;  %v3518_v58 = vld [vmem:[#allocation16_spill] sm:$0xff] }
  0xef   :  { %v2341_v41 = vpop.permute.xlu1 %427  ;;  %v2343_v2 = vpop.permute.xlu0 %422 }
  0xf0   :  { %3508 = vst [vmem:[#allocation75_spill] sm:$0xff] %v2341_v41  ;;  %3509 = vst [vmem:[#allocation76_spill] sm:$0xff] %v2343_v2  ;;  %v3519_v41 = vld [vmem:[#allocation15_spill] sm:$0xff] }
  0xf1   :  { %745 = vperm.xlu1 %1767, %v3510_v9   ;;  %749 = vperm.xlu0 %1766, %v3511_v33  }
  0xf3   :  { %v2347_v34 = vpop.permute.xlu1 %437  ;;  %v2349_v26 = vpop.permute.xlu0 %432 }
  0xf4   :  { %3512 = vst [vmem:[#allocation11_spill] sm:$0xff] %v2347_v34  ;;  %3513 = vst [vmem:[#allocation77_spill] sm:$0xff] %v2349_v26 }
  0xf5   :  { %753 = vperm.xlu1 %1767, %v3514_v25   ;;  %757 = vperm.xlu0 %1766, %v3515_v1  }
  0xf7   :  { %v2353_v50 = vpop.permute.xlu1 %447  ;;  %v2355_v42 = vpop.permute.xlu0 %442 }
  0xf8   :  { %3516 = vst [vmem:[#allocation13_spill] sm:$0xff] %v2353_v50  ;;  %3517 = vst [vmem:[#allocation78_spill] sm:$0xff] %v2355_v42 }
  0xf9   :  { %761 = vperm.xlu1 %1767, %v3518_v58   ;;  %765 = vperm.xlu0 %1766, %v3519_v41   ;;  %v1774_v41 = vmov 2  }
  0xfb   :  { %v2359_v2 = vpop.permute.xlu1 %457  ;;  %v2361_v9 = vpop.permute.xlu0 %452 }
  0xfc   :  { %3520 = vst [vmem:[#allocation16_spill] sm:$0xff] %v2359_v2  ;;  %3521 = vst [vmem:[#allocation79_spill] sm:$0xff] %v2361_v9 }
  0xfd   :  { %769 = vperm.xlu1 %1767, %v2159_v17   ;;  %773 = vperm.xlu0 %1766, %v2157_v57  }
 0x100   :  { %v2365_v26 = vpop.permute.xlu1 %533  ;;  %v2367_v34 = vpop.permute.xlu0 %529 }
 0x101   :  { %3522 = vst [vmem:[#allocation80_spill] sm:$0xff] %v2365_v26  ;;  %3523 = vst [vmem:[#allocation81_spill] sm:$0xff] %v2367_v34  ;;  %777 = vperm.xlu1 %1767, %v2171_v49   ;;  %781 = vperm.xlu0 %1766, %v2169_v18  }
 0x104   :  { %v2371_v42 = vpop.permute.xlu1 %537  ;;  %v2373_v50 = vpop.permute.xlu0 %541 }
 0x105   :  { %3524 = vst [vmem:[#allocation82_spill] sm:$0xff] %v2371_v42  ;;  %3525 = vst [vmem:[#allocation83_spill] sm:$0xff] %v2373_v50  ;;  %1768 = vset.pattern.permute.xlu1 %v1774_v41  ;;  %1769 = vset.pattern.permute.xlu0 %v1774_v41 }
 0x106   :  { %917 = vperm.xlu1 %1768, %v1802_v5   ;;  %921 = vperm.xlu0 %1769, %v1811_v8  }
 0x108   :  { %v2377_v9 = vpop.permute.xlu1 %545  ;;  %v2379_v2 = vpop.permute.xlu0 %549 }
 0x109   :  { %3526 = vst [vmem:[#allocation84_spill] sm:$0xff] %v2377_v9  ;;  %3527 = vst [vmem:[#allocation85_spill] sm:$0xff] %v2379_v2 }
 0x10a   :  { %925 = vperm.xlu1 %1768, %v1800_v4   ;;  %933 = vperm.xlu0 %1769, %v1823_v12  }
 0x10c   :  { %v2383_v26 = vpop.permute.xlu1 %553  ;;  %v2385_v42 = vpop.permute.xlu0 %557 }
 0x10d   :  { %3528 = vst [vmem:[#allocation86_spill] sm:$0xff] %v2383_v26  ;;  %3529 = vst [vmem:[#allocation87_spill] sm:$0xff] %v2385_v42 }
 0x10e   :  { %929 = vperm.xlu1 %1768, %v1809_v7   ;;  %941 = vperm.xlu0 %1769, %v1835_v16  }
 0x110   :  { %v2389_v41 = vpop.permute.xlu1 %561  ;;  %v2391_v50 = vpop.permute.xlu0 %565 }
 0x111   :  { %3530 = vst [vmem:[#allocation88_spill] sm:$0xff] %v2389_v41  ;;  %3531 = vst [vmem:[#allocation89_spill] sm:$0xff] %v2391_v50 }
 0x112   :  { %937 = vperm.xlu1 %1768, %v1821_v11   ;;  %949 = vperm.xlu0 %1769, %v1847_v20  }
 0x114   :  { %v2395_v9 = vpop.permute.xlu1 %569  ;;  %v2397_v2 = vpop.permute.xlu0 %573 }
 0x115   :  { %3532 = vst [vmem:[#allocation90_spill] sm:$0xff] %v2395_v9  ;;  %3533 = vst [vmem:[#allocation91_spill] sm:$0xff] %v2397_v2 }
 0x116   :  { %945 = vperm.xlu1 %1768, %v1833_v15   ;;  %957 = vperm.xlu0 %1769, %v1859_v24  }
 0x118   :  { %v2401_v26 = vpop.permute.xlu1 %577  ;;  %v2403_v42 = vpop.permute.xlu0 %581 }
 0x119   :  { %3534 = vst [vmem:[#allocation92_spill] sm:$0xff] %v2401_v26  ;;  %3535 = vst [vmem:[#allocation93_spill] sm:$0xff] %v2403_v42 }
 0x11a   :  { %953 = vperm.xlu1 %1768, %v1845_v19   ;;  %965 = vperm.xlu0 %1769, %v1871_v28  }
 0x11c   :  { %v2407_v41 = vpop.permute.xlu1 %585  ;;  %v2409_v50 = vpop.permute.xlu0 %589 }
 0x11d   :  { %3536 = vst [vmem:[#allocation94_spill] sm:$0xff] %v2407_v41  ;;  %3537 = vst [vmem:[#allocation95_spill] sm:$0xff] %v2409_v50 }
 0x11e   :  { %961 = vperm.xlu1 %1768, %v1857_v23   ;;  %973 = vperm.xlu0 %1769, %v1883_v32  }
 0x120   :  { %v2413_v9 = vpop.permute.xlu1 %593  ;;  %v2415_v2 = vpop.permute.xlu0 %597 }
 0x121   :  { %3538 = vst [vmem:[#allocation96_spill] sm:$0xff] %v2413_v9  ;;  %3539 = vst [vmem:[#allocation97_spill] sm:$0xff] %v2415_v2 }
 0x122   :  { %969 = vperm.xlu1 %1768, %v1869_v27   ;;  %981 = vperm.xlu0 %1769, %v1895_v36  }
 0x124   :  { %v2419_v26 = vpop.permute.xlu1 %601  ;;  %v2421_v42 = vpop.permute.xlu0 %605 }
 0x125   :  { %3540 = vst [vmem:[#allocation98_spill] sm:$0xff] %v2419_v26  ;;  %3541 = vst [vmem:[#allocation99_spill] sm:$0xff] %v2421_v42 }
 0x126   :  { %977 = vperm.xlu1 %1768, %v1881_v31   ;;  %989 = vperm.xlu0 %1769, %v1907_v40  }
 0x128   :  { %v2425_v41 = vpop.permute.xlu1 %609  ;;  %v2427_v50 = vpop.permute.xlu0 %613 }
 0x129   :  { %3542 = vst [vmem:[#allocation100_spill] sm:$0xff] %v2425_v41  ;;  %3543 = vst [vmem:[#allocation101_spill] sm:$0xff] %v2427_v50 }
 0x12a   :  { %985 = vperm.xlu1 %1768, %v1893_v35   ;;  %997 = vperm.xlu0 %1769, %v1919_v44  }
 0x12c   :  { %v2431_v9 = vpop.permute.xlu1 %617  ;;  %v2433_v2 = vpop.permute.xlu0 %621 }
 0x12d   :  { %3544 = vst [vmem:[#allocation102_spill] sm:$0xff] %v2431_v9  ;;  %3545 = vst [vmem:[#allocation103_spill] sm:$0xff] %v2433_v2 }
 0x12e   :  { %993 = vperm.xlu1 %1768, %v1905_v39   ;;  %1005 = vperm.xlu0 %1769, %v1931_v48  }
 0x130   :  { %v2437_v26 = vpop.permute.xlu1 %625  ;;  %v2439_v42 = vpop.permute.xlu0 %629 }
 0x131   :  { %3546 = vst [vmem:[#allocation104_spill] sm:$0xff] %v2437_v26  ;;  %3547 = vst [vmem:[#allocation105_spill] sm:$0xff] %v2439_v42 }
 0x132   :  { %1001 = vperm.xlu1 %1768, %v1917_v43   ;;  %1013 = vperm.xlu0 %1769, %v1943_v52  }
 0x134   :  { %v2443_v41 = vpop.permute.xlu1 %633  ;;  %v2445_v50 = vpop.permute.xlu0 %637 }
 0x135   :  { %3548 = vst [vmem:[#allocation106_spill] sm:$0xff] %v2443_v41  ;;  %3549 = vst [vmem:[#allocation107_spill] sm:$0xff] %v2445_v50 }
 0x136   :  { %1009 = vperm.xlu1 %1768, %v1929_v47   ;;  %1021 = vperm.xlu0 %1769, %v1955_v56  }
 0x138   :  { %v2449_v9 = vpop.permute.xlu1 %641  ;;  %v2451_v2 = vpop.permute.xlu0 %645 }
 0x139   :  { %3550 = vst [vmem:[#allocation108_spill] sm:$0xff] %v2449_v9  ;;  %3551 = vst [vmem:[#allocation109_spill] sm:$0xff] %v2451_v2 }
 0x13a   :  { %1017 = vperm.xlu1 %1768, %v1941_v51   ;;  %1029 = vperm.xlu0 %1769, %v1967_v60  }
 0x13c   :  { %v2455_v26 = vpop.permute.xlu1 %649  ;;  %v2457_v42 = vpop.permute.xlu0 %653 }
 0x13d   :  { %3552 = vst [vmem:[#allocation110_spill] sm:$0xff] %v2455_v26  ;;  %3553 = vst [vmem:[#allocation111_spill] sm:$0xff] %v2457_v42 }
 0x13e   :  { %1025 = vperm.xlu1 %1768, %v1953_v55   ;;  %1037 = vperm.xlu0 %1769, %v1979_v0  }
 0x140   :  { %v2461_v41 = vpop.permute.xlu1 %657  ;;  %v2463_v50 = vpop.permute.xlu0 %661 }
 0x141   :  { %3554 = vst [vmem:[#allocation112_spill] sm:$0xff] %v2461_v41  ;;  %3555 = vst [vmem:[#allocation113_spill] sm:$0xff] %v2463_v50 }
 0x142   :  { %1033 = vperm.xlu1 %1768, %v1965_v59   ;;  %1045 = vperm.xlu0 %1769, %v1991_v6  }
 0x144   :  { %v2467_v9 = vpop.permute.xlu1 %665  ;;  %v2469_v2 = vpop.permute.xlu0 %669 }
 0x145   :  { %3556 = vst [vmem:[#allocation114_spill] sm:$0xff] %v2467_v9  ;;  %3557 = vst [vmem:[#allocation115_spill] sm:$0xff] %v2469_v2 }
 0x146   :  { %1041 = vperm.xlu1 %1768, %v1977_v63   ;;  %1053 = vperm.xlu0 %1769, %v2003_v14  }
 0x148   :  { %v2473_v26 = vpop.permute.xlu1 %673  ;;  %v2475_v42 = vpop.permute.xlu0 %677 }
 0x149   :  { %3558 = vst [vmem:[#allocation116_spill] sm:$0xff] %v2473_v26  ;;  %3559 = vst [vmem:[#allocation117_spill] sm:$0xff] %v2475_v42 }
 0x14a   :  { %1049 = vperm.xlu1 %1768, %v1989_v3   ;;  %1061 = vperm.xlu0 %1769, %v2015_v22  }
 0x14c   :  { %v2479_v41 = vpop.permute.xlu1 %681  ;;  %v2481_v50 = vpop.permute.xlu0 %685 }
 0x14d   :  { %3560 = vst [vmem:[#allocation118_spill] sm:$0xff] %v2479_v41  ;;  %3561 = vst [vmem:[#allocation119_spill] sm:$0xff] %v2481_v50 }
 0x14e   :  { %1057 = vperm.xlu1 %1768, %v2001_v13   ;;  %1069 = vperm.xlu0 %1769, %v2027_v30  }
 0x150   :  { %v2485_v9 = vpop.permute.xlu1 %689  ;;  %v2487_v2 = vpop.permute.xlu0 %693 }
 0x151   :  { %3562 = vst [vmem:[#allocation120_spill] sm:$0xff] %v2485_v9  ;;  %3563 = vst [vmem:[#allocation121_spill] sm:$0xff] %v2487_v2 }
 0x152   :  { %1065 = vperm.xlu1 %1768, %v2013_v21   ;;  %1077 = vperm.xlu0 %1769, %v2039_v38  }
 0x154   :  { %v2491_v26 = vpop.permute.xlu1 %697  ;;  %v2493_v42 = vpop.permute.xlu0 %701 }
 0x155   :  { %3564 = vst [vmem:[#allocation122_spill] sm:$0xff] %v2491_v26  ;;  %3565 = vst [vmem:[#allocation123_spill] sm:$0xff] %v2493_v42 }
 0x156   :  { %1073 = vperm.xlu1 %1768, %v2025_v29   ;;  %1085 = vperm.xlu0 %1769, %v2051_v46  }
 0x158   :  { %v2497_v41 = vpop.permute.xlu1 %705  ;;  %v2499_v50 = vpop.permute.xlu0 %709 }
 0x159   :  { %3566 = vst [vmem:[#allocation124_spill] sm:$0xff] %v2497_v41  ;;  %3567 = vst [vmem:[#allocation125_spill] sm:$0xff] %v2499_v50 }
 0x15a   :  { %1081 = vperm.xlu1 %1768, %v2037_v37   ;;  %1093 = vperm.xlu0 %1769, %v2063_v54  }
 0x15c   :  { %v2503_v9 = vpop.permute.xlu1 %713  ;;  %v2505_v2 = vpop.permute.xlu0 %717 }
 0x15d   :  { %3568 = vst [vmem:[#allocation126_spill] sm:$0xff] %v2503_v9  ;;  %3569 = vst [vmem:[#allocation127_spill] sm:$0xff] %v2505_v2  ;;  %v3574_v9 = vld [vmem:[#allocation8_spill] sm:$0xff] }
 0x15e   :  { %1089 = vperm.xlu1 %1768, %v2049_v45   ;;  %1101 = vperm.xlu0 %1769, %v2075_v62   ;;  %v3577_v62 = vld [vmem:[#allocation5_spill] sm:$0xff] }
 0x160   :  { %v2509_v26 = vpop.permute.xlu1 %721  ;;  %v2511_v42 = vpop.permute.xlu0 %725 }
 0x161   :  { %3570 = vst [vmem:[#allocation128_spill] sm:$0xff] %v2509_v26  ;;  %3571 = vst [vmem:[#allocation129_spill] sm:$0xff] %v2511_v42  ;;  %v3578_v26 = vld [vmem:[#allocation10_spill] sm:$0xff] }
 0x162   :  { %1097 = vperm.xlu1 %1768, %v2061_v53   ;;  %1109 = vperm.xlu0 %1769, %v2087_v10   ;;  %v3581_v10 = vld [vmem:[#allocation7_spill] sm:$0xff] }
 0x164   :  { %v2515_v41 = vpop.permute.xlu1 %729  ;;  %v2517_v50 = vpop.permute.xlu0 %733 }
 0x165   :  { %3572 = vst [vmem:[#allocation130_spill] sm:$0xff] %v2515_v41  ;;  %3573 = vst [vmem:[#allocation131_spill] sm:$0xff] %v2517_v50  ;;  %v3582_v41 = vld [vmem:[#allocation12_spill] sm:$0xff] }
 0x166   :  { %1105 = vperm.xlu1 %1768, %v2073_v61   ;;  %1117 = vperm.xlu0 %1769, %v3574_v9   ;;  %v3585_v9 = vld [vmem:[#allocation9_spill] sm:$0xff] }
 0x168   :  { %v2521_v2 = vpop.permute.xlu1 %737  ;;  %v2523_v34 = vpop.permute.xlu0 %741 }
 0x169   :  { %3575 = vst [vmem:[#allocation132_spill] sm:$0xff] %v2521_v2  ;;  %3576 = vst [vmem:[#allocation133_spill] sm:$0xff] %v2523_v34 }
 0x16a   :  { %1113 = vperm.xlu1 %1768, %v3577_v62   ;;  %1125 = vperm.xlu0 %1769, %v3578_v26  }
 0x16c   :  { %v2527_v42 = vpop.permute.xlu1 %745  ;;  %v2529_v54 = vpop.permute.xlu0 %749 }
 0x16d   :  { %3579 = vst [vmem:[#allocation5_spill] sm:$0xff] %v2527_v42  ;;  %3580 = vst [vmem:[#allocation10_spill] sm:$0xff] %v2529_v54 }
 0x16e   :  { %1121 = vperm.xlu1 %1768, %v3581_v10   ;;  %1133 = vperm.xlu0 %1769, %v3582_v41  }
 0x170   :  { %v2533_v50 = vpop.permute.xlu1 %753  ;;  %v2535_v61 = vpop.permute.xlu0 %757 }
 0x171   :  { %3583 = vst [vmem:[#allocation7_spill] sm:$0xff] %v2533_v50  ;;  %3584 = vst [vmem:[#allocation12_spill] sm:$0xff] %v2535_v61 }
 0x172   :  { %1129 = vperm.xlu1 %1768, %v3585_v9   ;;  %1141 = vperm.xlu0 %1769, %v3514_v25   ;;  %v3592_v25 = vld [vmem:[#allocation15_spill] sm:$0xff] }
 0x174   :  { %v2539_v2 = vpop.permute.xlu1 %761  ;;  %v2541_v34 = vpop.permute.xlu0 %765 }
 0x175   :  { %3586 = vst [vmem:[#allocation9_spill] sm:$0xff] %v2539_v2  ;;  %3587 = vst [vmem:[#allocation134_spill] sm:$0xff] %v2541_v34 }
 0x176   :  { %1137 = vperm.xlu1 %1768, %v3511_v33   ;;  %1149 = vperm.xlu0 %1769, %v3518_v58  }
 0x178   :  { %v2545_v42 = vpop.permute.xlu1 %769  ;;  %v2547_v54 = vpop.permute.xlu0 %773 }
 0x179   :  { %3588 = vst [vmem:[#allocation135_spill] sm:$0xff] %v2545_v42  ;;  %3589 = vst [vmem:[#allocation136_spill] sm:$0xff] %v2547_v54  ;;  %v1775_v42 = vmov 3  }
 0x17a   :  { %1145 = vperm.xlu1 %1768, %v3515_v1   ;;  %1157 = vperm.xlu0 %1769, %v2159_v17  }
 0x17c   :  { %v2551_v50 = vpop.permute.xlu1 %777  ;;  %v2553_v61 = vpop.permute.xlu0 %781 }
 0x17d   :  { %3590 = vst [vmem:[#allocation137_spill] sm:$0xff] %v2551_v50  ;;  %3591 = vst [vmem:[#allocation138_spill] sm:$0xff] %v2553_v61 }
 0x17e   :  { %1153 = vperm.xlu1 %1768, %v3592_v25   ;;  %1165 = vperm.xlu0 %1769, %v2171_v49  }
 0x181   :  { %v2557_v2 = vpop.permute.xlu1 %917  ;;  %v2559_v34 = vpop.permute.xlu0 %921 }
 0x182   :  { %1161 = vperm.xlu1 %1768, %v2157_v57   ;;  %1770 = vset.pattern.permute.xlu0 %v1775_v42 }
 0x183   :  { %1305 = vperm.xlu0 %1770, %v1802_v5  }
 0x185   :  { %v2563_v54 = vpop.permute.xlu1 %925  ;;  %v2565_v17 = vpop.permute.xlu0 %933 }
 0x186   :  { %3593 = vst [vmem:[#allocation15_spill] sm:$0xff] %v2565_v17  ;;  %1169 = vperm.xlu1 %1768, %v2169_v18  }
 0x187   :  { %1317 = vperm.xlu0 %1770, %v1809_v7  }
 0x189   :  { %v2569_v50 = vpop.permute.xlu1 %929  ;;  %v2571_v61 = vpop.permute.xlu0 %941 }
 0x18a   :  { %1771 = vset.pattern.permute.xlu1 %v1775_v42 }
 0x18b   :  { %1309 = vperm.xlu1 %1771, %v1811_v8   ;;  %1325 = vperm.xlu0 %1770, %v1821_v11  }
 0x18d   :  { %v2575_v49 = vpop.permute.xlu1 %937  ;;  %v2577_v5 = vpop.permute.xlu0 %949 }
 0x18f   :  { %1313 = vperm.xlu1 %1771, %v1800_v4   ;;  %1333 = vperm.xlu0 %1770, %v1833_v15  }
 0x191   :  { %v2581_v17 = vpop.permute.xlu1 %945  ;;  %v2583_v7 = vpop.permute.xlu0 %957 }
 0x193   :  { %1321 = vperm.xlu1 %1771, %v1823_v12   ;;  %1341 = vperm.xlu0 %1770, %v1845_v19  }
 0x195   :  { %v2587_v42 = vpop.permute.xlu1 %953  ;;  %v2589_v8 = vpop.permute.xlu0 %965 }
 0x197   :  { %1329 = vperm.xlu1 %1771, %v1835_v16   ;;  %1349 = vperm.xlu0 %1770, %v1857_v23  }
 0x199   :  { %v2593_v11 = vpop.permute.xlu1 %961  ;;  %v2595_v4 = vpop.permute.xlu0 %973 }
 0x19b   :  { %1337 = vperm.xlu1 %1771, %v1847_v20   ;;  %1357 = vperm.xlu0 %1770, %v1869_v27  }
 0x19d   :  { %v2599_v15 = vpop.permute.xlu1 %969  ;;  %v2601_v12 = vpop.permute.xlu0 %981 }
 0x19f   :  { %1345 = vperm.xlu1 %1771, %v1859_v24   ;;  %1365 = vperm.xlu0 %1770, %v1881_v31  }
 0x1a1   :  { %v2605_v19 = vpop.permute.xlu1 %977  ;;  %v2607_v16 = vpop.permute.xlu0 %989 }
 0x1a3   :  { %1353 = vperm.xlu1 %1771, %v1871_v28   ;;  %1373 = vperm.xlu0 %1770, %v1893_v35  }
 0x1a5   :  { %v2611_v23 = vpop.permute.xlu1 %985  ;;  %v2613_v20 = vpop.permute.xlu0 %997 }
 0x1a7   :  { %1361 = vperm.xlu1 %1771, %v1883_v32   ;;  %1381 = vperm.xlu0 %1770, %v1905_v39  }
 0x1a9   :  { %v2617_v27 = vpop.permute.xlu1 %993  ;;  %v2619_v24 = vpop.permute.xlu0 %1005 }
 0x1ab   :  { %1369 = vperm.xlu1 %1771, %v1895_v36   ;;  %1389 = vperm.xlu0 %1770, %v1917_v43  }
 0x1ad   :  { %v2623_v31 = vpop.permute.xlu1 %1001  ;;  %v2625_v28 = vpop.permute.xlu0 %1013 }
 0x1af   :  { %1377 = vperm.xlu1 %1771, %v1907_v40   ;;  %1397 = vperm.xlu0 %1770, %v1929_v47  }
 0x1b1   :  { %v2629_v35 = vpop.permute.xlu1 %1009  ;;  %v2631_v32 = vpop.permute.xlu0 %1021 }
 0x1b3   :  { %1385 = vperm.xlu1 %1771, %v1919_v44   ;;  %1405 = vperm.xlu0 %1770, %v1941_v51  }
 0x1b5   :  { %v2635_v39 = vpop.permute.xlu1 %1017  ;;  %v2637_v36 = vpop.permute.xlu0 %1029 }
 0x1b7   :  { %1393 = vperm.xlu1 %1771, %v1931_v48   ;;  %1413 = vperm.xlu0 %1770, %v1953_v55  }
 0x1b9   :  { %v2641_v43 = vpop.permute.xlu1 %1025  ;;  %v2643_v40 = vpop.permute.xlu0 %1037 }
 0x1bb   :  { %1401 = vperm.xlu1 %1771, %v1943_v52   ;;  %1421 = vperm.xlu0 %1770, %v1965_v59  }
 0x1bd   :  { %v2647_v47 = vpop.permute.xlu1 %1033  ;;  %v2649_v44 = vpop.permute.xlu0 %1045 }
 0x1bf   :  { %1409 = vperm.xlu1 %1771, %v1955_v56   ;;  %1429 = vperm.xlu0 %1770, %v1977_v63  }
 0x1c1   :  { %v2653_v51 = vpop.permute.xlu1 %1041  ;;  %v2655_v48 = vpop.permute.xlu0 %1053 }
 0x1c3   :  { %1417 = vperm.xlu1 %1771, %v1967_v60   ;;  %1437 = vperm.xlu0 %1770, %v1989_v3  }
 0x1c5   :  { %v2659_v55 = vpop.permute.xlu1 %1049  ;;  %v2661_v52 = vpop.permute.xlu0 %1061 }
 0x1c7   :  { %1425 = vperm.xlu1 %1771, %v1979_v0   ;;  %1445 = vperm.xlu0 %1770, %v2001_v13  }
 0x1c9   :  { %v2665_v59 = vpop.permute.xlu1 %1057  ;;  %v2667_v56 = vpop.permute.xlu0 %1069 }
 0x1cb   :  { %1433 = vperm.xlu1 %1771, %v1991_v6   ;;  %1453 = vperm.xlu0 %1770, %v2013_v21  }
 0x1cd   :  { %v2671_v63 = vpop.permute.xlu1 %1065  ;;  %v2673_v60 = vpop.permute.xlu0 %1077 }
 0x1ce   :  { %3594 = vst [vmem:[#allocation139_spill] sm:$0xff] %v2673_v60 }
 0x1cf   :  { %1441 = vperm.xlu1 %1771, %v2003_v14   ;;  %1461 = vperm.xlu0 %1770, %v2025_v29  }
 0x1d1   :  { %v2677_v3 = vpop.permute.xlu1 %1073  ;;  %v2679_v0 = vpop.permute.xlu0 %1085 }
 0x1d2   :  { %3595 = vst [vmem:[#allocation140_spill] sm:$0xff] %v2679_v0 }
 0x1d3   :  { %1449 = vperm.xlu1 %1771, %v2015_v22   ;;  %1469 = vperm.xlu0 %1770, %v2037_v37   ;;  %v3601_v37 = vld [vmem:[#allocation3_spill] sm:$0xff] }
 0x1d5   :  { %v2683_v13 = vpop.permute.xlu1 %1081  ;;  %v2685_v6 = vpop.permute.xlu0 %1093 }
 0x1d6   :  { %3596 = vst [vmem:[#allocation141_spill] sm:$0xff] %v2685_v6 }
 0x1d7   :  { %1457 = vperm.xlu1 %1771, %v2027_v30   ;;  %1477 = vperm.xlu0 %1770, %v2049_v45   ;;  %v3604_v45 = vld [vmem:[#allocation2_spill] sm:$0xff] }
 0x1d9   :  { %v2689_v21 = vpop.permute.xlu1 %1089  ;;  %v2691_v14 = vpop.permute.xlu0 %1101 }
 0x1da   :  { %3597 = vst [vmem:[#allocation142_spill] sm:$0xff] %v2689_v21  ;;  %3598 = vst [vmem:[#allocation143_spill] sm:$0xff] %v2691_v14 }
 0x1db   :  { %1465 = vperm.xlu1 %1771, %v2039_v38   ;;  %1485 = vperm.xlu0 %1770, %v2061_v53   ;;  %v3607_v53 = vld [vmem:[#allocation4_spill] sm:$0xff] }
 0x1dd   :  { %v2695_v29 = vpop.permute.xlu1 %1097  ;;  %v2697_v22 = vpop.permute.xlu0 %1109 }
 0x1de   :  { %3599 = vst [vmem:[#allocation144_spill] sm:$0xff] %v2695_v29  ;;  %3600 = vst [vmem:[#allocation145_spill] sm:$0xff] %v2697_v22 }
 0x1df   :  { %1473 = vperm.xlu1 %1771, %v2051_v46   ;;  %1493 = vperm.xlu0 %1770, %v3601_v37   ;;  %v460_v37 = vlaneseq }
 0x1e1   :  { %v2701_v6 = vpop.permute.xlu1 %1105  ;;  %v2703_v30 = vpop.permute.xlu0 %1117 }
 0x1e2   :  { %3602 = vst [vmem:[#allocation3_spill] sm:$0xff] %v2701_v6  ;;  %3603 = vst [vmem:[#allocation146_spill] sm:$0xff] %v2703_v30  ;;  %v3610_v6 = vld [vmem:[#allocation6_spill] sm:$0xff]  ;;  %v461_v30 = vshrl.u32 %v460_v37, 7 }
 0x1e3   :  { %1481 = vperm.xlu1 %1771, %v3604_v45   ;;  %1501 = vperm.xlu0 %1770, %v3577_v62  }
 0x1e5   :  { %v2707_v14 = vpop.permute.xlu1 %1113  ;;  %v2709_v38 = vpop.permute.xlu0 %1125 }
 0x1e6   :  { %3605 = vst [vmem:[#allocation2_spill] sm:$0xff] %v2707_v14  ;;  %3606 = vst [vmem:[#allocation147_spill] sm:$0xff] %v2709_v38  ;;  %v3613_v14 = vld [vmem:[#allocation8_spill] sm:$0xff] }
 0x1e7   :  { %1489 = vperm.xlu1 %1771, %v3607_v53   ;;  %1509 = vperm.xlu0 %1770, %v3581_v10   ;;  %v786_v53 = vsub.s32 1, %v461_v30 }
 0x1e9   :  { %v2713_v22 = vpop.permute.xlu1 %1121  ;;  %v2715_v46 = vpop.permute.xlu0 %1133 }
 0x1ea   :  { %3608 = vst [vmem:[#allocation4_spill] sm:$0xff] %v2713_v22  ;;  %3609 = vst [vmem:[#allocation148_spill] sm:$0xff] %v2715_v46  ;;  %v1174_v46 = vsub.s32 2, %v461_v30  ;;  %v3621_v22 = vld [vmem:[#allocation20_spill] sm:$0xff] }
 0x1eb   :  { %1497 = vperm.xlu1 %1771, %v3610_v6   ;;  %1517 = vperm.xlu0 %1770, %v3585_v9   ;;  %v139_v9 = vld [vmem:[%s3403_s1] sm:$0xf]  ;;  %v462_v6 = vsub.s32 0, %v461_v30 }
 0x1ec   :  { %v2734_v37 = vrot.slane %v139_v9, %v786_v53 }
 0x1ed   :  { %v2719_v45 = vpop.permute.xlu1 %1129  ;;  %v2721_v62 = vpop.permute.xlu0 %1141 }
 0x1ee   :  { %3611 = vst [vmem:[#allocation6_spill] sm:$0xff] %v2719_v45  ;;  %3612 = vst [vmem:[#allocation149_spill] sm:$0xff] %v2721_v62  ;;  %v2740_v62 = vrot.slane %v139_v9, %v1174_v46 }
 0x1ef   :  { %1505 = vperm.xlu1 %1771, %v3613_v14   ;;  %1525 = vperm.xlu0 %1770, %v3511_v33  }
 0x1f0   :  { %v1176_v46 = vmul.f32 %v2740_v62, %v2557_v2  ;;  %v1179_v2 = vmul.f32 %v2740_v62, %v2569_v50  ;;  %v1177_v50 = vmul.f32 %v2740_v62, %v2559_v34 }
 0x1f1   :  { %v2725_v10 = vpop.permute.xlu1 %1137  ;;  %v2727_v38 = vpop.permute.xlu0 %1149 }
 0x1f2   :  { %3614 = vst [vmem:[#allocation8_spill] sm:$0xff] %v2725_v10  ;;  %3615 = vst [vmem:[#allocation150_spill] sm:$0xff] %v2727_v38  ;;  %v2744_v38 = vrot.slane %v139_v9, %v462_v6 }
 0x1f3   :  { %1513 = vperm.xlu1 %1771, %v3578_v26   ;;  %1533 = vperm.xlu0 %1770, %v3515_v1   ;;  %v1562_v26 = vsub.s32 3, %v461_v30  ;;  %v3618_v1 = vld [vmem:[#allocation81_spill] sm:$0xff]  ;;  %v3623_v30 = vld [vmem:[#allocation83_spill] sm:$0xff] }
 0x1f4   :  { %v788_v10 = vmul.f32 %v2734_v37, %v3618_v1  ;;  %v791_v6 = vmul.f32 %v2734_v37, %v3623_v30 }
 0x1f5   :  { %v2736_v14 = vpop.permute.xlu1 %1145  ;;  %v2738_v33 = vpop.permute.xlu0 %1157 }
 0x1f6   :  { %3616 = vst [vmem:[#allocation151_spill] sm:$0xff] %v2736_v14  ;;  %3617 = vst [vmem:[#allocation152_spill] sm:$0xff] %v2738_v33  ;;  %v464_v14 = vmul.f32 %v2744_v38, %v3621_v22  ;;  %v3622_v33 = vld [vmem:[#allocation14_spill] sm:$0xff] }
 0x1f7   :  { %1521 = vperm.xlu1 %1771, %v3582_v41   ;;  %1541 = vperm.xlu0 %1770, %v3592_v25   ;;  %v2758_v25 = vrot.slane %v139_v9, %v1562_v26 }
 0x1f8   :  { %v852_v41 = vadd.f32 %v788_v10, %v464_v14  ;;  %v3627_v14 = vld [vmem:[#allocation85_spill] sm:$0xff] }
 0x1f9   :  { %v2748_v45 = vpop.permute.xlu1 %1153  ;;  %v2750_v53 = vpop.permute.xlu0 %1165  ;;  %v793_v26 = vmul.f32 %v2734_v37, %v3627_v14 }
 0x1fa   :  { %3619 = vst [vmem:[#allocation81_spill] sm:$0xff] %v2748_v45  ;;  %3620 = vst [vmem:[#allocation153_spill] sm:$0xff] %v2750_v53  ;;  %v3625_v45 = vld [vmem:[#allocation21_spill] sm:$0xff]  ;;  %v1240_v22 = vadd.f32 %v1176_v46, %v852_v41  ;;  %v3629_v46 = vld [vmem:[#allocation22_spill] sm:$0xff] }
 0x1fb   :  { %1529 = vperm.xlu1 %1771, %v3622_v33   ;;  %1549 = vperm.xlu0 %1770, %v2157_v57   ;;  %v467_v53 = vmul.f32 %v2744_v38, %v3625_v45  ;;  %v3626_v57 = vld [vmem:[#allocation80_spill] sm:$0xff]  ;;  %v465_v41 = vmul.f32 %v2744_v38, %v3629_v46  ;;  %v3633_v46 = vld [vmem:[#allocation87_spill] sm:$0xff] }
 0x1fc   :  { %v789_v10 = vmul.f32 %v2734_v37, %v3626_v57  ;;  %v3632_v57 = vld [vmem:[#allocation82_spill] sm:$0xff] }
 0x1fd   :  { %v2762_v1 = vpop.permute.xlu1 %1161  ;;  %v855_v9 = vadd.f32 %v791_v6, %v467_v53  ;;  %v1181_v53 = vmul.f32 %v2740_v62, %v2575_v49  ;;  %v790_v34 = vmul.f32 %v2734_v37, %v3632_v57  ;;  %v3638_v57 = vld [vmem:[#allocation89_spill] sm:$0xff] }
 0x1fe   :  { %3624 = vst [vmem:[#allocation20_spill] sm:$0xff] %v2762_v1  ;;  %v1306_v0 = vpop.permute.xlu0 %1305 }
 0x1ff   :  { %v1564_v33 = vmul.f32 %v2758_v25, %v1306_v0  ;;  %1537 = vperm.xlu1 %1771, %v3518_v58   ;;  %1557 = vperm.xlu0 %1770, %v2169_v18   ;;  %v3630_v58 = vld [vmem:[#allocation23_spill] sm:$0xff]  ;;  %v1243_v1 = vadd.f32 %v1179_v2, %v855_v9 }
 0x200   :  { %v469_v18 = vmul.f32 %v2744_v38, %v3630_v58  ;;  %v795_v58 = vmul.f32 %v2734_v37, %v3633_v46  ;;  %v3634_v9 = vld [vmem:[#allocation19_spill] sm:$0xff]  ;;  %v3639_v46 = vld [vmem:[#allocation24_spill] sm:$0xff] }
 0x201   :  { %v1628_v30 = vadd.f32 %v1564_v33, %v1240_v22  ;;  %v2775_v45 = vpop.permute.xlu1 %1169  ;;  %v3631_v22 = vld [vmem:[#allocation17_spill] sm:$0xff]  ;;  %v853_v33 = vadd.f32 %v789_v10, %v465_v41  ;;  %v466_v49 = vmul.f32 %v2744_v38, %v3634_v9  ;;  %v468_v9 = vmul.f32 %v2744_v38, %v3639_v46 }
 0x202   :  { %3628 = vst [vmem:[#allocation14_spill] sm:$0xff] %v2775_v45  ;;  %v1318_v0 = vpop.permute.xlu0 %1317  ;;  %v857_v14 = vadd.f32 %v793_v26, %v469_v18  ;;  %v3635_v45 = vld [vmem:[#allocation25_spill] sm:$0xff]  ;;  %v1183_v26 = vmul.f32 %v2740_v62, %v2581_v17 }
 0x203   :  { %1692 = vst [vmem:[%s3404_s2] sm:$0xff] %v1628_v30  ;;  %v1567_v6 = vmul.f32 %v2758_v25, %v1318_v0  ;;  %1545 = vperm.xlu1 %1771, %v3631_v22   ;;  %v471_v29 = vmul.f32 %v2744_v38, %v3635_v45  ;;  %v1241_v30 = vadd.f32 %v1177_v50, %v853_v33  ;;  %v3637_v50 = vld [vmem:[#allocation84_spill] sm:$0xff] }
 0x204   :  { %v1178_v0 = vmul.f32 %v2740_v62, %v2563_v54  ;;  %v1245_v41 = vadd.f32 %v1181_v53, %v857_v14  ;;  %v854_v45 = vadd.f32 %v790_v34, %v466_v49  ;;  %v792_v54 = vmul.f32 %v2734_v37, %v3637_v50 }
 0x205   :  { %v1631_v2 = vadd.f32 %v1567_v6, %v1243_v1  ;;  %v3636_v6 = vld [vmem:[#allocation18_spill] sm:$0xff]  ;;  %v859_v33 = vadd.f32 %v795_v58, %v471_v29  ;;  %v797_v53 = vmul.f32 %v2734_v37, %v3638_v57  ;;  %v1185_v29 = vmul.f32 %v2740_v62, %v2587_v42 }
 0x206   :  { %v1310_v22 = vpop.permute.xlu1 %1309  ;;  %v1326_v10 = vpop.permute.xlu0 %1325  ;;  %v1242_v60 = vadd.f32 %v1178_v0, %v854_v45  ;;  %v856_v0 = vadd.f32 %v792_v54, %v468_v9 }
 0x207   :  { %1695 = vst [vmem:[%s3404_s2 + $0x18] sm:$0xff] %v1631_v2  ;;  %v1565_v1 = vmul.f32 %v2758_v25, %v1310_v22  ;;  %v1569_v18 = vmul.f32 %v2758_v25, %v1326_v10  ;;  %1553 = vperm.xlu1 %1771, %v3636_v6   ;;  %v3640_v2 = vld [vmem:[#allocation27_spill] sm:$0xff]  ;;  %v1247_v21 = vadd.f32 %v1183_v26, %v859_v33  ;;  %v3644_v33 = vld [vmem:[#allocation26_spill] sm:$0xff] }
 0x208   :  { %v473_v22 = vmul.f32 %v2744_v38, %v3640_v2  ;;  %v3641_v10 = vld [vmem:[#allocation15_spill] sm:$0xff]  ;;  %v470_v57 = vmul.f32 %v2744_v38, %v3644_v33  ;;  %v1182_v2 = vmul.f32 %v2740_v62, %v2571_v61  ;;  %v3646_v61 = vld [vmem:[#allocation88_spill] sm:$0xff] }
 0x209   :  { %v1629_v14 = vadd.f32 %v1565_v1, %v1241_v30  ;;  %v1633_v17 = vadd.f32 %v1569_v18, %v1245_v41  ;;  %v1180_v6 = vmul.f32 %v2740_v62, %v3641_v10  ;;  %v3642_v41 = vld [vmem:[#allocation86_spill] sm:$0xff]  ;;  %v3643_v18 = vld [vmem:[#allocation91_spill] sm:$0xff] }
 0x20a   :  { %v1314_v34 = vpop.permute.xlu1 %1313  ;;  %v1334_v49 = vpop.permute.xlu0 %1333  ;;  %v794_v1 = vmul.f32 %v2734_v37, %v3642_v41  ;;  %v861_v26 = vadd.f32 %v797_v53, %v473_v22  ;;  %v799_v42 = vmul.f32 %v2734_v37, %v3643_v18  ;;  %v1187_v53 = vmul.f32 %v2740_v62, %v2593_v11  ;;  %v3649_v41 = vld [vmem:[#allocation31_spill] sm:$0xff] }
 0x20b   :  { %1693 = vst [vmem:[%s3404_s2 + $0x8] sm:$0xff] %v1629_v14  ;;  %1697 = vst [vmem:[%s3404_s2 + $0x28] sm:$0xff] %v1633_v17  ;;  %v1566_v58 = vmul.f32 %v2758_v25, %v1314_v34  ;;  %v1571_v30 = vmul.f32 %v2758_v25, %v1334_v49  ;;  %v3645_v14 = vld [vmem:[#allocation29_spill] sm:$0xff]  ;;  %v1244_v46 = vadd.f32 %v1180_v6, %v856_v0 }
 0x20c   :  { %v475_v17 = vmul.f32 %v2744_v38, %v3645_v14  ;;  %v1249_v10 = vadd.f32 %v1185_v29, %v861_v26  ;;  %v858_v22 = vadd.f32 %v794_v1, %v470_v57  ;;  %v796_v6 = vmul.f32 %v2734_v37, %v3646_v61  ;;  %v3647_v49 = vld [vmem:[#allocation93_spill] sm:$0xff] }
 0x20d   :  { %v1630_v45 = vadd.f32 %v1566_v58, %v1242_v60  ;;  %v1635_v50 = vadd.f32 %v1571_v30, %v1247_v21  ;;  %v801_v11 = vmul.f32 %v2734_v37, %v3647_v49  ;;  %v3648_v30 = vld [vmem:[#allocation28_spill] sm:$0xff]  ;;  %v477_v26 = vmul.f32 %v2744_v38, %v3649_v41 }
 0x20e   :  { %v1322_v54 = vpop.permute.xlu1 %1321  ;;  %v1342_v9 = vpop.permute.xlu0 %1341  ;;  %v863_v34 = vadd.f32 %v799_v42, %v475_v17  ;;  %v472_v0 = vmul.f32 %v2744_v38, %v3648_v30  ;;  %v1246_v18 = vadd.f32 %v1182_v2, %v858_v22  ;;  %v1189_v42 = vmul.f32 %v2740_v62, %v2599_v15 }
 0x20f   :  { %1694 = vst [vmem:[%s3404_s2 + $0x10] sm:$0xff] %v1630_v45  ;;  %1699 = vst [vmem:[%s3404_s2 + $0x38] sm:$0xff] %v1635_v50  ;;  %v1568_v60 = vmul.f32 %v2758_v25, %v1322_v54  ;;  %v1573_v21 = vmul.f32 %v2758_v25, %v1342_v9  ;;  %v1184_v45 = vmul.f32 %v2740_v62, %v2577_v5  ;;  %v3650_v5 = vld [vmem:[#allocation90_spill] sm:$0xff]  ;;  %v3651_v54 = vld [vmem:[#allocation95_spill] sm:$0xff] }
 0x210   :  { %v1251_v33 = vadd.f32 %v1187_v53, %v863_v34  ;;  %v860_v17 = vadd.f32 %v796_v6, %v472_v0  ;;  %v865_v2 = vadd.f32 %v801_v11, %v477_v26  ;;  %v803_v15 = vmul.f32 %v2734_v37, %v3651_v54  ;;  %v3652_v53 = vld [vmem:[#allocation30_spill] sm:$0xff] }
 0x211   :  { %v1632_v29 = vadd.f32 %v1568_v60, %v1244_v46  ;;  %v1637_v58 = vadd.f32 %v1573_v21, %v1249_v10  ;;  %v798_v46 = vmul.f32 %v2734_v37, %v3650_v5  ;;  %v474_v60 = vmul.f32 %v2744_v38, %v3652_v53  ;;  %v3653_v21 = vld [vmem:[#allocation33_spill] sm:$0xff] }
 0x212   :  { %v1330_v1 = vpop.permute.xlu1 %1329  ;;  %v1350_v50 = vpop.permute.xlu0 %1349  ;;  %v479_v22 = vmul.f32 %v2744_v38, %v3653_v21  ;;  %v1248_v61 = vadd.f32 %v1184_v45, %v860_v17  ;;  %v1186_v34 = vmul.f32 %v2740_v62, %v2583_v7  ;;  %v1191_v11 = vmul.f32 %v2740_v62, %v2605_v19  ;;  %v3654_v7 = vld [vmem:[#allocation92_spill] sm:$0xff]  ;;  %v3659_v21 = vld [vmem:[#allocation99_spill] sm:$0xff] }
 0x213   :  { %1696 = vst [vmem:[%s3404_s2 + $0x20] sm:$0xff] %v1632_v29  ;;  %1701 = vst [vmem:[%s3404_s2 + $0x48] sm:$0xff] %v1637_v58  ;;  %v1570_v57 = vmul.f32 %v2758_v25, %v1330_v1  ;;  %v1575_v14 = vmul.f32 %v2758_v25, %v1350_v50  ;;  %v1253_v29 = vadd.f32 %v1189_v42, %v865_v2  ;;  %v3656_v50 = vld [vmem:[#allocation32_spill] sm:$0xff]  ;;  %v3657_v42 = vld [vmem:[#allocation35_spill] sm:$0xff] }
 0x214   :  { %v862_v0 = vadd.f32 %v798_v46, %v474_v60  ;;  %v800_v41 = vmul.f32 %v2734_v37, %v3654_v7  ;;  %v867_v26 = vadd.f32 %v803_v15, %v479_v22  ;;  %v1188_v17 = vmul.f32 %v2740_v62, %v2589_v8  ;;  %v3658_v8 = vld [vmem:[#allocation94_spill] sm:$0xff] }
 0x215   :  { %v1634_v9 = vadd.f32 %v1570_v57, %v1246_v18  ;;  %v1639_v10 = vadd.f32 %v1575_v14, %v1251_v33  ;;  %v3655_v18 = vld [vmem:[#allocation97_spill] sm:$0xff]  ;;  %v476_v33 = vmul.f32 %v2744_v38, %v3656_v50  ;;  %v481_v57 = vmul.f32 %v2744_v38, %v3657_v42 }
 0x216   :  { %v1338_v6 = vpop.permute.xlu1 %1337  ;;  %v1358_v49 = vpop.permute.xlu0 %1357  ;;  %v805_v19 = vmul.f32 %v2734_v37, %v3655_v18  ;;  %v1250_v14 = vadd.f32 %v1186_v34, %v862_v0  ;;  %v1255_v2 = vadd.f32 %v1191_v11, %v867_v26  ;;  %v1193_v54 = vmul.f32 %v2740_v62, %v2611_v23  ;;  %v3660_v34 = vld [vmem:[#allocation34_spill] sm:$0xff]  ;;  %v3663_v50 = vld [vmem:[#allocation101_spill] sm:$0xff] }
 0x217   :  { %1698 = vst [vmem:[%s3404_s2 + $0x30] sm:$0xff] %v1634_v9  ;;  %1703 = vst [vmem:[%s3404_s2 + $0x58] sm:$0xff] %v1639_v10  ;;  %v1572_v58 = vmul.f32 %v2758_v25, %v1338_v6  ;;  %v1577_v30 = vmul.f32 %v2758_v25, %v1358_v49  ;;  %v864_v10 = vadd.f32 %v800_v41, %v476_v33  ;;  %v3661_v49 = vld [vmem:[#allocation37_spill] sm:$0xff] }
 0x218   :  { %v802_v53 = vmul.f32 %v2734_v37, %v3658_v8  ;;  %v869_v60 = vadd.f32 %v805_v19, %v481_v57  ;;  %v807_v23 = vmul.f32 %v2734_v37, %v3659_v21  ;;  %v478_v6 = vmul.f32 %v2744_v38, %v3660_v34  ;;  %v3664_v57 = vld [vmem:[#allocation36_spill] sm:$0xff] }
 0x219   :  { %v1636_v45 = vadd.f32 %v1572_v58, %v1248_v61  ;;  %v1641_v1 = vadd.f32 %v1577_v30, %v1253_v29  ;;  %v483_v29 = vmul.f32 %v2744_v38, %v3661_v49  ;;  %v1252_v11 = vadd.f32 %v1188_v17, %v864_v10  ;;  %v3665_v17 = vld [vmem:[#allocation39_spill] sm:$0xff] }
 0x21a   :  { %v1346_v5 = vpop.permute.xlu1 %1345  ;;  %v1366_v46 = vpop.permute.xlu0 %1365  ;;  %v1190_v58 = vmul.f32 %v2740_v62, %v2595_v4  ;;  %v1257_v7 = vadd.f32 %v1193_v54, %v869_v60  ;;  %v1195_v41 = vmul.f32 %v2740_v62, %v2617_v27  ;;  %v866_v19 = vadd.f32 %v802_v53, %v478_v6  ;;  %v3662_v4 = vld [vmem:[#allocation96_spill] sm:$0xff]  ;;  %v3668_v6 = vld [vmem:[#allocation38_spill] sm:$0xff] }
 0x21b   :  { %1700 = vst [vmem:[%s3404_s2 + $0x40] sm:$0xff] %v1636_v45  ;;  %1705 = vst [vmem:[%s3404_s2 + $0x68] sm:$0xff] %v1641_v1  ;;  %v1574_v15 = vmul.f32 %v2758_v25, %v1346_v5  ;;  %v1579_v9 = vmul.f32 %v2758_v25, %v1366_v46  ;;  %v804_v45 = vmul.f32 %v2734_v37, %v3662_v4 }
 0x21c   :  { %v871_v1 = vadd.f32 %v807_v23, %v483_v29  ;;  %v809_v27 = vmul.f32 %v2734_v37, %v3663_v50  ;;  %v485_v5 = vmul.f32 %v2744_v38, %v3665_v17  ;;  %v1254_v46 = vadd.f32 %v1190_v58, %v866_v19  ;;  %v3669_v29 = vld [vmem:[#allocation41_spill] sm:$0xff] }
 0x21d   :  { %v1638_v22 = vadd.f32 %v1574_v15, %v1250_v14  ;;  %v1643_v61 = vadd.f32 %v1579_v9, %v1255_v2  ;;  %v480_v14 = vmul.f32 %v2744_v38, %v3664_v57  ;;  %v1192_v2 = vmul.f32 %v2740_v62, %v2601_v12  ;;  %v3666_v12 = vld [vmem:[#allocation98_spill] sm:$0xff]  ;;  %v3671_v50 = vld [vmem:[#allocation105_spill] sm:$0xff] }
 0x21e   :  { %v1354_v30 = vpop.permute.xlu1 %1353  ;;  %v1374_v0 = vpop.permute.xlu0 %1373  ;;  %v1259_v9 = vadd.f32 %v1195_v41, %v871_v1  ;;  %v1197_v10 = vmul.f32 %v2740_v62, %v2623_v31  ;;  %v806_v21 = vmul.f32 %v2734_v37, %v3666_v12  ;;  %v873_v23 = vadd.f32 %v809_v27, %v485_v5 }
 0x21f   :  { %1702 = vst [vmem:[%s3404_s2 + $0x50] sm:$0xff] %v1638_v22  ;;  %1707 = vst [vmem:[%s3404_s2 + $0x78] sm:$0xff] %v1643_v61  ;;  %v1576_v26 = vmul.f32 %v2758_v25, %v1354_v30  ;;  %v1581_v18 = vmul.f32 %v2758_v25, %v1374_v0  ;;  %v868_v60 = vadd.f32 %v804_v45, %v480_v14  ;;  %v3667_v22 = vld [vmem:[#allocation103_spill] sm:$0xff] }
 0x220   :  { %v811_v31 = vmul.f32 %v2734_v37, %v3667_v22  ;;  %v482_v49 = vmul.f32 %v2744_v38, %v3668_v6  ;;  %v1194_v30 = vmul.f32 %v2740_v62, %v2607_v16  ;;  %v1261_v41 = vadd.f32 %v1197_v10, %v873_v23  ;;  %v3670_v16 = vld [vmem:[#allocation100_spill] sm:$0xff]  ;;  %v3673_v14 = vld [vmem:[#allocation43_spill] sm:$0xff] }
 0x221   :  { %v1640_v33 = vadd.f32 %v1576_v26, %v1252_v11  ;;  %v1645_v42 = vadd.f32 %v1581_v18, %v1257_v7  ;;  %v487_v11 = vmul.f32 %v2744_v38, %v3669_v29  ;;  %v1256_v58 = vadd.f32 %v1192_v2, %v868_v60 }
 0x222   :  { %v1362_v54 = vpop.permute.xlu1 %1361  ;;  %v1382_v15 = vpop.permute.xlu0 %1381  ;;  %v1199_v26 = vmul.f32 %v2740_v62, %v2629_v35  ;;  %v870_v4 = vadd.f32 %v806_v21, %v482_v49  ;;  %v808_v45 = vmul.f32 %v2734_v37, %v3670_v16  ;;  %v813_v35 = vmul.f32 %v2734_v37, %v3671_v50  ;;  %v3675_v21 = vld [vmem:[#allocation107_spill] sm:$0xff] }
 0x223   :  { %1704 = vst [vmem:[%s3404_s2 + $0x60] sm:$0xff] %v1640_v33  ;;  %1709 = vst [vmem:[%s3404_s2 + $0x88] sm:$0xff] %v1645_v42  ;;  %v1578_v8 = vmul.f32 %v2758_v25, %v1362_v54  ;;  %v1583_v53 = vmul.f32 %v2758_v25, %v1382_v15  ;;  %v875_v1 = vadd.f32 %v811_v31, %v487_v11  ;;  %v3672_v42 = vld [vmem:[#allocation40_spill] sm:$0xff]  ;;  %v3676_v31 = vld [vmem:[#allocation42_spill] sm:$0xff] }
 0x224   :  { %v484_v57 = vmul.f32 %v2744_v38, %v3672_v42  ;;  %v489_v17 = vmul.f32 %v2744_v38, %v3673_v14  ;;  %v1258_v5 = vadd.f32 %v1194_v30, %v870_v4  ;;  %v1198_v29 = vmul.f32 %v2740_v62, %v2619_v24  ;;  %v3678_v24 = vld [vmem:[#allocation104_spill] sm:$0xff]  ;;  %v3679_v4 = vld [vmem:[#allocation109_spill] sm:$0xff] }
 0x225   :  { %v1642_v61 = vadd.f32 %v1578_v8, %v1254_v46  ;;  %v1647_v34 = vadd.f32 %v1583_v53, %v1259_v9  ;;  %v1196_v46 = vmul.f32 %v2740_v62, %v2613_v20  ;;  %v1263_v15 = vadd.f32 %v1199_v26, %v875_v1  ;;  %v3674_v20 = vld [vmem:[#allocation102_spill] sm:$0xff]  ;;  %v3680_v1 = vld [vmem:[#allocation44_spill] sm:$0xff] }
 0x226   :  { %v1370_v0 = vpop.permute.xlu1 %1369  ;;  %v1390_v7 = vpop.permute.xlu0 %1389  ;;  %v1201_v9 = vmul.f32 %v2740_v62, %v2635_v39  ;;  %v872_v53 = vadd.f32 %v808_v45, %v484_v57  ;;  %v810_v60 = vmul.f32 %v2734_v37, %v3674_v20  ;;  %v877_v12 = vadd.f32 %v813_v35, %v489_v17  ;;  %v3681_v35 = vld [vmem:[#allocation47_spill] sm:$0xff]  ;;  %v3684_v20 = vld [vmem:[#allocation46_spill] sm:$0xff] }
 0x227   :  { %1706 = vst [vmem:[%s3404_s2 + $0x70] sm:$0xff] %v1642_v61  ;;  %1711 = vst [vmem:[%s3404_s2 + $0x98] sm:$0xff] %v1647_v34  ;;  %v1580_v18 = vmul.f32 %v2758_v25, %v1370_v0  ;;  %v1585_v19 = vmul.f32 %v2758_v25, %v1390_v7  ;;  %v815_v39 = vmul.f32 %v2734_v37, %v3675_v21  ;;  %v3677_v34 = vld [vmem:[#allocation45_spill] sm:$0xff] }
 0x228   :  { %v486_v61 = vmul.f32 %v2744_v38, %v3676_v31  ;;  %v491_v6 = vmul.f32 %v2744_v38, %v3677_v34  ;;  %v1260_v49 = vadd.f32 %v1196_v46, %v872_v53  ;;  %v1265_v30 = vadd.f32 %v1201_v9, %v877_v12  ;;  %v3685_v12 = vld [vmem:[#allocation49_spill] sm:$0xff] }
 0x229   :  { %v1644_v27 = vadd.f32 %v1580_v18, %v1256_v58  ;;  %v1649_v33 = vadd.f32 %v1585_v19, %v1261_v41  ;;  %v1203_v0 = vmul.f32 %v2740_v62, %v2641_v43  ;;  %v812_v18 = vmul.f32 %v2734_v37, %v3678_v24  ;;  %v3689_v24 = vld [vmem:[#allocation51_spill] sm:$0xff] }
 0x22a   :  { %v1378_v2 = vpop.permute.xlu1 %1377  ;;  %v1398_v54 = vpop.permute.xlu0 %1397  ;;  %v874_v26 = vadd.f32 %v810_v60, %v486_v61  ;;  %v879_v19 = vadd.f32 %v815_v39, %v491_v6  ;;  %v817_v43 = vmul.f32 %v2734_v37, %v3679_v4  ;;  %v488_v50 = vmul.f32 %v2744_v38, %v3680_v1 }
 0x22b   :  { %1708 = vst [vmem:[%s3404_s2 + $0x80] sm:$0xff] %v1644_v27  ;;  %1713 = vst [vmem:[%s3404_s2 + $0xa8] sm:$0xff] %v1649_v33  ;;  %v1582_v10 = vmul.f32 %v2758_v25, %v1378_v2  ;;  %v1587_v8 = vmul.f32 %v2758_v25, %v1398_v54  ;;  %v493_v27 = vmul.f32 %v2744_v38, %v3681_v35 }
 0x22c   :  { %v1262_v33 = vadd.f32 %v1198_v29, %v874_v26  ;;  %v1200_v42 = vmul.f32 %v2740_v62, %v2625_v28  ;;  %v1267_v17 = vadd.f32 %v1203_v0, %v879_v19  ;;  %v876_v54 = vadd.f32 %v812_v18, %v488_v50  ;;  %v3682_v28 = vld [vmem:[#allocation106_spill] sm:$0xff] }
 0x22d   :  { %v1646_v23 = vadd.f32 %v1582_v10, %v1258_v5  ;;  %v1651_v22 = vadd.f32 %v1587_v8, %v1263_v15  ;;  %v1205_v5 = vmul.f32 %v2740_v62, %v2647_v47  ;;  %v814_v15 = vmul.f32 %v2734_v37, %v3682_v28  ;;  %v3683_v10 = vld [vmem:[#allocation111_spill] sm:$0xff] }
 0x22e   :  { %v1386_v11 = vpop.permute.xlu1 %1385  ;;  %v1406_v58 = vpop.permute.xlu0 %1405  ;;  %v881_v9 = vadd.f32 %v817_v43, %v493_v27  ;;  %v819_v47 = vmul.f32 %v2734_v37, %v3683_v10  ;;  %v490_v60 = vmul.f32 %v2744_v38, %v3684_v20  ;;  %v495_v21 = vmul.f32 %v2744_v38, %v3685_v12 }
 0x22f   :  { %1710 = vst [vmem:[%s3404_s2 + $0x90] sm:$0xff] %v1646_v23  ;;  %1715 = vst [vmem:[%s3404_s2 + $0xb8] sm:$0xff] %v1651_v22  ;;  %v1584_v7 = vmul.f32 %v2758_v25, %v1386_v11  ;;  %v1589_v41 = vmul.f32 %v2758_v25, %v1406_v58  ;;  %v1264_v39 = vadd.f32 %v1200_v42, %v876_v54 }
 0x230   :  { %v1202_v23 = vmul.f32 %v2740_v62, %v2631_v32  ;;  %v1269_v61 = vadd.f32 %v1205_v5, %v881_v9  ;;  %v1207_v34 = vmul.f32 %v2740_v62, %v2653_v51  ;;  %v878_v29 = vadd.f32 %v814_v15, %v490_v60  ;;  %v3686_v32 = vld [vmem:[#allocation108_spill] sm:$0xff]  ;;  %v3692_v5 = vld [vmem:[#allocation50_spill] sm:$0xff] }
 0x231   :  { %v1648_v16 = vadd.f32 %v1584_v7, %v1260_v49  ;;  %v1653_v45 = vadd.f32 %v1589_v41, %v1265_v30  ;;  %v816_v11 = vmul.f32 %v2734_v37, %v3686_v32  ;;  %v883_v58 = vadd.f32 %v819_v47, %v495_v21  ;;  %v3687_v30 = vld [vmem:[#allocation113_spill] sm:$0xff]  ;;  %v3688_v41 = vld [vmem:[#allocation48_spill] sm:$0xff] }
 0x232   :  { %v1394_v57 = vpop.permute.xlu1 %1393  ;;  %v1414_v14 = vpop.permute.xlu0 %1413  ;;  %v821_v51 = vmul.f32 %v2734_v37, %v3687_v30  ;;  %v492_v26 = vmul.f32 %v2744_v38, %v3688_v41  ;;  %v497_v18 = vmul.f32 %v2744_v38, %v3689_v24  ;;  %v1266_v19 = vadd.f32 %v1202_v23, %v878_v29  ;;  %v3699_v24 = vld [vmem:[#allocation119_spill] sm:$0xff] }
 0x233   :  { %1712 = vst [vmem:[%s3404_s2 + $0xa0] sm:$0xff] %v1648_v16  ;;  %1717 = vst [vmem:[%s3404_s2 + $0xc8] sm:$0xff] %v1653_v45  ;;  %v1586_v46 = vmul.f32 %v2758_v25, %v1394_v57  ;;  %v1591_v2 = vmul.f32 %v2758_v25, %v1414_v14  ;;  %v1204_v4 = vmul.f32 %v2740_v62, %v2637_v36  ;;  %v3690_v36 = vld [vmem:[#allocation110_spill] sm:$0xff]  ;;  %v3691_v57 = vld [vmem:[#allocation115_spill] sm:$0xff] }
 0x234   :  { %v1271_v45 = vadd.f32 %v1207_v34, %v883_v58  ;;  %v1209_v1 = vmul.f32 %v2740_v62, %v2659_v55  ;;  %v880_v27 = vadd.f32 %v816_v11, %v492_v26  ;;  %v885_v42 = vadd.f32 %v821_v51, %v497_v18  ;;  %v3697_v34 = vld [vmem:[#allocation55_spill] sm:$0xff] }
 0x235   :  { %v1650_v8 = vadd.f32 %v1586_v46, %v1262_v33  ;;  %v1655_v53 = vadd.f32 %v1591_v2, %v1267_v17  ;;  %v818_v33 = vmul.f32 %v2734_v37, %v3690_v36  ;;  %v823_v55 = vmul.f32 %v2734_v37, %v3691_v57  ;;  %v3693_v2 = vld [vmem:[#allocation53_spill] sm:$0xff] }
 0x236   :  { %v1402_v22 = vpop.permute.xlu1 %1401  ;;  %v1422_v31 = vpop.permute.xlu0 %1421  ;;  %v494_v46 = vmul.f32 %v2744_v38, %v3692_v5  ;;  %v499_v54 = vmul.f32 %v2744_v38, %v3693_v2  ;;  %v1268_v28 = vadd.f32 %v1204_v4, %v880_v27  ;;  %v1206_v15 = vmul.f32 %v2740_v62, %v2643_v40  ;;  %v3694_v40 = vld [vmem:[#allocation112_spill] sm:$0xff]  ;;  %v3700_v4 = vld [vmem:[#allocation54_spill] sm:$0xff]  ;;  %v3703_v5 = vld [vmem:[#allocation121_spill] sm:$0xff] }
 0x237   :  { %1714 = vst [vmem:[%s3404_s2 + $0xb0] sm:$0xff] %v1650_v8  ;;  %1719 = vst [vmem:[%s3404_s2 + $0xd8] sm:$0xff] %v1655_v53  ;;  %v1588_v6 = vmul.f32 %v2758_v25, %v1402_v22  ;;  %v1593_v49 = vmul.f32 %v2758_v25, %v1422_v31  ;;  %v1273_v47 = vadd.f32 %v1209_v1, %v885_v42  ;;  %v3696_v31 = vld [vmem:[#allocation52_spill] sm:$0xff] }
 0x238   :  { %v1211_v8 = vmul.f32 %v2740_v62, %v2665_v59  ;;  %v882_v60 = vadd.f32 %v818_v33, %v494_v46  ;;  %v820_v12 = vmul.f32 %v2734_v37, %v3694_v40  ;;  %v887_v21 = vadd.f32 %v823_v55, %v499_v54  ;;  %v3704_v54 = vld [vmem:[#allocation56_spill] sm:$0xff] }
 0x239   :  { %v1652_v0 = vadd.f32 %v1588_v6, %v1264_v39  ;;  %v1657_v7 = vadd.f32 %v1593_v49, %v1269_v61  ;;  %v3695_v39 = vld [vmem:[#allocation117_spill] sm:$0xff]  ;;  %v496_v61 = vmul.f32 %v2744_v38, %v3696_v31  ;;  %v501_v6 = vmul.f32 %v2744_v38, %v3697_v34 }
 0x23a   :  { %v1410_v43 = vpop.permute.xlu1 %1409  ;;  %v1430_v16 = vpop.permute.xlu0 %1429  ;;  %v825_v59 = vmul.f32 %v2734_v37, %v3695_v39  ;;  %v1270_v49 = vadd.f32 %v1206_v15, %v882_v60  ;;  %v1208_v29 = vmul.f32 %v2740_v62, %v2649_v44  ;;  %v1275_v58 = vadd.f32 %v1211_v8, %v887_v21  ;;  %v3698_v44 = vld [vmem:[#allocation114_spill] sm:$0xff]  ;;  %v3705_v15 = vld [vmem:[#allocation59_spill] sm:$0xff] }
 0x23b   :  { %1716 = vst [vmem:[%s3404_s2 + $0xc0] sm:$0xff] %v1652_v0  ;;  %1721 = vst [vmem:[%s3404_s2 + $0xe8] sm:$0xff] %v1657_v7  ;;  %v1590_v50 = vmul.f32 %v2758_v25, %v1410_v43  ;;  %v1595_v35 = vmul.f32 %v2758_v25, %v1430_v16  ;;  %v1213_v30 = vmul.f32 %v2740_v62, %v2671_v63  ;;  %v3701_v16 = vld [vmem:[#allocation57_spill] sm:$0xff] }
 0x23c   :  { %v884_v7 = vadd.f32 %v820_v12, %v496_v61  ;;  %v822_v41 = vmul.f32 %v2734_v37, %v3698_v44  ;;  %v889_v26 = vadd.f32 %v825_v59, %v501_v6  ;;  %v827_v63 = vmul.f32 %v2734_v37, %v3699_v24  ;;  %v3708_v61 = vld [vmem:[#allocation58_spill] sm:$0xff]  ;;  %v3709_v6 = vld [vmem:[#allocation61_spill] sm:$0xff] }
 0x23d   :  { %v1654_v14 = vadd.f32 %v1590_v50, %v1266_v19  ;;  %v1659_v17 = vadd.f32 %v1595_v35, %v1271_v45  ;;  %v498_v43 = vmul.f32 %v2744_v38, %v3700_v4  ;;  %v503_v45 = vmul.f32 %v2744_v38, %v3701_v16 }
 0x23e   :  { %v1418_v9 = vpop.permute.xlu1 %1417  ;;  %v1438_v10 = vpop.permute.xlu0 %1437  ;;  %v1272_v1 = vadd.f32 %v1208_v29, %v884_v7  ;;  %v1210_v50 = vmul.f32 %v2740_v62, %v2655_v48  ;;  %v1277_v36 = vadd.f32 %v1213_v30, %v889_v26  ;;  %v1215_v33 = vmul.f32 %v2740_v62, %v2677_v3  ;;  %v3702_v48 = vld [vmem:[#allocation116_spill] sm:$0xff] }
 0x23f   :  { %1718 = vst [vmem:[%s3404_s2 + $0xd0] sm:$0xff] %v1654_v14  ;;  %1723 = vst [vmem:[%s3404_s2 + $0xf8] sm:$0xff] %v1659_v17  ;;  %v1592_v53 = vmul.f32 %v2758_v25, %v1418_v9  ;;  %v1597_v20 = vmul.f32 %v2758_v25, %v1438_v10  ;;  %v886_v55 = vadd.f32 %v822_v41, %v498_v43  ;;  %v3713_v43 = vld [vmem:[#allocation60_spill] sm:$0xff] }
 0x240   :  { %v824_v14 = vmul.f32 %v2734_v37, %v3702_v48  ;;  %v891_v17 = vadd.f32 %v827_v63, %v503_v45  ;;  %v829_v3 = vmul.f32 %v2734_v37, %v3703_v5  ;;  %v505_v9 = vmul.f32 %v2744_v38, %v3705_v15  ;;  %v3712_v63 = vld [vmem:[#allocation125_spill] sm:$0xff]  ;;  %v3714_v45 = vld [vmem:[#allocation63_spill] sm:$0xff]  ;;  %v3717_v5 = vld [vmem:[#allocation122_spill] sm:$0xff] }
 0x241   :  { %v1656_v23 = vadd.f32 %v1592_v53, %v1268_v28  ;;  %v1661_v22 = vadd.f32 %v1597_v20, %v1273_v47  ;;  %v500_v28 = vmul.f32 %v2744_v38, %v3704_v54  ;;  %v1274_v10 = vadd.f32 %v1210_v50, %v886_v55 }
 0x242   :  { %v1426_v32 = vpop.permute.xlu1 %1425  ;;  %v1446_v11 = vpop.permute.xlu0 %1445  ;;  %v1212_v47 = vmul.f32 %v2740_v62, %v2661_v52  ;;  %v1279_v20 = vadd.f32 %v1215_v33, %v891_v17  ;;  %v1217_v60 = vmul.f32 %v2740_v62, %v2683_v13  ;;  %v3706_v52 = vld [vmem:[#allocation118_spill] sm:$0xff]  ;;  %v893_v59 = vadd.f32 %v829_v3, %v505_v9 }
 0x243   :  { %1720 = vst [vmem:[%s3404_s2 + $0xe0] sm:$0xff] %v1656_v23  ;;  %1725 = vst [vmem:[%s3404_s2 + $0x108] sm:$0xff] %v1661_v22  ;;  %v1594_v51 = vmul.f32 %v2758_v25, %v1426_v32  ;;  %v1599_v0 = vmul.f32 %v2758_v25, %v1446_v11  ;;  %v888_v21 = vadd.f32 %v824_v14, %v500_v28  ;;  %v3707_v23 = vld [vmem:[#allocation123_spill] sm:$0xff]  ;;  %v3719_v9 = vld [vmem:[#allocation62_spill] sm:$0xff] }
 0x244   :  { %v826_v39 = vmul.f32 %v2734_v37, %v3706_v52  ;;  %v831_v13 = vmul.f32 %v2734_v37, %v3707_v23  ;;  %v502_v34 = vmul.f32 %v2744_v38, %v3708_v61  ;;  %v1214_v32 = vmul.f32 %v2740_v62, %v2667_v56  ;;  %v3711_v56 = vld [vmem:[#allocation120_spill] sm:$0xff]  ;;  %v3722_v52 = vld [vmem:[#allocation3_spill] sm:$0xff] }
 0x245   :  { %v1658_v18 = vadd.f32 %v1594_v51, %v1270_v49  ;;  %v1663_v19 = vadd.f32 %v1599_v0, %v1275_v58  ;;  %v507_v49 = vmul.f32 %v2744_v38, %v3709_v6  ;;  %v1276_v29 = vadd.f32 %v1212_v47, %v888_v21  ;;  %v3710_v51 = vld [vmem:[#allocation142_spill] sm:$0xff]  ;;  %v3720_v47 = vld [vmem:[#allocation65_spill] sm:$0xff] }
 0x246   :  { %v1434_v35 = vpop.permute.xlu1 %1433  ;;  %v1454_v27 = vpop.permute.xlu0 %1453  ;;  %v1281_v30 = vadd.f32 %v1217_v60, %v893_v59  ;;  %v1219_v0 = vmul.f32 %v2740_v62, %v3710_v51  ;;  %v890_v41 = vadd.f32 %v826_v39, %v502_v34  ;;  %v828_v26 = vmul.f32 %v2734_v37, %v3711_v56  ;;  %v3724_v34 = vld [vmem:[#allocation129_spill] sm:$0xff] }
 0x247   :  { %1722 = vst [vmem:[%s3404_s2 + $0xf0] sm:$0xff] %v1658_v18  ;;  %1727 = vst [vmem:[%s3404_s2 + $0x118] sm:$0xff] %v1663_v19  ;;  %v1596_v42 = vmul.f32 %v2758_v25, %v1434_v35  ;;  %v1601_v57 = vmul.f32 %v2758_v25, %v1454_v27  ;;  %v895_v24 = vadd.f32 %v831_v13, %v507_v49  ;;  %v3715_v35 = vld [vmem:[#allocation139_spill] sm:$0xff] }
 0x248   :  { %v833_v18 = vmul.f32 %v2734_v37, %v3712_v63  ;;  %v504_v16 = vmul.f32 %v2744_v38, %v3713_v43  ;;  %v1278_v50 = vadd.f32 %v1214_v32, %v890_v41  ;;  %v1216_v27 = vmul.f32 %v2740_v62, %v3715_v35  ;;  %v3725_v32 = vld [vmem:[#allocation64_spill] sm:$0xff] }
 0x249   :  { %v1660_v46 = vadd.f32 %v1596_v42, %v1272_v1  ;;  %v1665_v2 = vadd.f32 %v1601_v57, %v1277_v36  ;;  %v509_v1 = vmul.f32 %v2744_v38, %v3714_v45  ;;  %v1283_v42 = vadd.f32 %v1219_v0, %v895_v24  ;;  %v3716_v57 = vld [vmem:[#allocation144_spill] sm:$0xff]  ;;  %v3727_v0 = vld [vmem:[#allocation141_spill] sm:$0xff]  ;;  %v3730_v45 = vld [vmem:[#allocation131_spill] sm:$0xff] }
 0x24a   :  { %v1442_v8 = vpop.permute.xlu1 %1441  ;;  %v1462_v53 = vpop.permute.xlu0 %1461  ;;  %v1221_v55 = vmul.f32 %v2740_v62, %v3716_v57  ;;  %v892_v17 = vadd.f32 %v828_v26, %v504_v16  ;;  %v830_v3 = vmul.f32 %v2734_v37, %v3717_v5  ;;  %v1223_v39 = vmul.f32 %v2740_v62, %v3722_v52  ;;  %v3728_v26 = vld [vmem:[#allocation2_spill] sm:$0xff] }
 0x24b   :  { %1724 = vst [vmem:[%s3404_s2 + $0x100] sm:$0xff] %v1660_v46  ;;  %1729 = vst [vmem:[%s3404_s2 + $0x128] sm:$0xff] %v1665_v2  ;;  %v1598_v40 = vmul.f32 %v2758_v25, %v1442_v8  ;;  %v1603_v12 = vmul.f32 %v2758_v25, %v1462_v53  ;;  %v897_v46 = vadd.f32 %v833_v18, %v509_v1  ;;  %v3718_v2 = vld [vmem:[#allocation127_spill] sm:$0xff] }
 0x24c   :  { %v835_v54 = vmul.f32 %v2734_v37, %v3718_v2  ;;  %v511_v8 = vmul.f32 %v2744_v38, %v3720_v47  ;;  %v1280_v53 = vadd.f32 %v1216_v27, %v892_v17  ;;  %v837_v6 = vmul.f32 %v2734_v37, %v3724_v34  ;;  %v3731_v27 = vld [vmem:[#allocation66_spill] sm:$0xff]  ;;  %v3736_v47 = vld [vmem:[#allocation133_spill] sm:$0xff] }
 0x24d   :  { %v1662_v22 = vadd.f32 %v1598_v40, %v1274_v10  ;;  %v1667_v31 = vadd.f32 %v1603_v12, %v1279_v20  ;;  %v506_v10 = vmul.f32 %v2744_v38, %v3719_v9  ;;  %v3721_v20 = vld [vmem:[#allocation140_spill] sm:$0xff]  ;;  %v1285_v21 = vadd.f32 %v1221_v55, %v897_v46  ;;  %v3733_v55 = vld [vmem:[#allocation143_spill] sm:$0xff] }
 0x24e   :  { %v1450_v11 = vpop.permute.xlu1 %1449  ;;  %v1470_v58 = vpop.permute.xlu0 %1469  ;;  %v1218_v60 = vmul.f32 %v2740_v62, %v3721_v20  ;;  %v899_v61 = vadd.f32 %v835_v54, %v511_v8  ;;  %v1225_v24 = vmul.f32 %v2740_v62, %v3728_v26  ;;  %v839_v1 = vmul.f32 %v2734_v37, %v3730_v45 }
 0x24f   :  { %1726 = vst [vmem:[%s3404_s2 + $0x110] sm:$0xff] %v1662_v22  ;;  %1731 = vst [vmem:[%s3404_s2 + $0x138] sm:$0xff] %v1667_v31  ;;  %v1600_v7 = vmul.f32 %v2758_v25, %v1450_v11  ;;  %v1605_v44 = vmul.f32 %v2758_v25, %v1470_v58  ;;  %v894_v13 = vadd.f32 %v830_v3, %v506_v10  ;;  %v3723_v22 = vld [vmem:[#allocation124_spill] sm:$0xff]  ;;  %v3726_v58 = vld [vmem:[#allocation67_spill] sm:$0xff] }
 0x250   :  { %v832_v31 = vmul.f32 %v2734_v37, %v3723_v22  ;;  %v508_v11 = vmul.f32 %v2744_v38, %v3725_v32  ;;  %v1287_v56 = vadd.f32 %v1223_v39, %v899_v61  ;;  %v3734_v3 = vld [vmem:[#allocation4_spill] sm:$0xff]  ;;  %v841_v8 = vmul.f32 %v2734_v37, %v3736_v47  ;;  %v3739_v39 = vld [vmem:[#allocation145_spill] sm:$0xff] }
 0x251   :  { %v1664_v19 = vadd.f32 %v1600_v7, %v1276_v29  ;;  %v1669_v4 = vadd.f32 %v1605_v44, %v1281_v30  ;;  %v513_v30 = vmul.f32 %v2744_v38, %v3726_v58  ;;  %v1282_v51 = vadd.f32 %v1218_v60, %v894_v13  ;;  %v3737_v60 = vld [vmem:[#allocation68_spill] sm:$0xff]  ;;  %v3742_v58 = vld [vmem:[#allocation10_spill] sm:$0xff] }
 0x252   :  { %v1458_v36 = vpop.permute.xlu1 %1457  ;;  %v1478_v33 = vpop.permute.xlu0 %1477  ;;  %v1220_v7 = vmul.f32 %v2740_v62, %v3727_v0  ;;  %v1227_v46 = vmul.f32 %v2740_v62, %v3734_v3 }
 0x253   :  { %1728 = vst [vmem:[%s3404_s2 + $0x120] sm:$0xff] %v1664_v19  ;;  %1733 = vst [vmem:[%s3404_s2 + $0x148] sm:$0xff] %v1669_v4  ;;  %v1602_v48 = vmul.f32 %v2758_v25, %v1458_v36  ;;  %v1607_v14 = vmul.f32 %v2758_v25, %v1478_v33  ;;  %v896_v19 = vadd.f32 %v832_v31, %v508_v11  ;;  %v3729_v4 = vld [vmem:[#allocation126_spill] sm:$0xff]  ;;  %v3732_v33 = vld [vmem:[#allocation69_spill] sm:$0xff] }
 0x254   :  { %v834_v43 = vmul.f32 %v2734_v37, %v3729_v4  ;;  %v901_v16 = vadd.f32 %v837_v6, %v513_v30  ;;  %v510_v36 = vmul.f32 %v2744_v38, %v3731_v27  ;;  %v3740_v31 = vld [vmem:[#allocation6_spill] sm:$0xff]  ;;  %v843_v30 = vmul.f32 %v2734_v37, %v3742_v58 }
 0x255   :  { %v1666_v28 = vadd.f32 %v1602_v48, %v1278_v50  ;;  %v1671_v15 = vadd.f32 %v1607_v14, %v1283_v42  ;;  %v515_v42 = vmul.f32 %v2744_v38, %v3732_v33  ;;  %v1284_v57 = vadd.f32 %v1220_v7, %v896_v19  ;;  %v3743_v7 = vld [vmem:[#allocation70_spill] sm:$0xff]  ;;  %v3748_v33 = vld [vmem:[#allocation12_spill] sm:$0xff] }
 0x256   :  { %v1466_v40 = vpop.permute.xlu1 %1465  ;;  %v1486_v12 = vpop.permute.xlu0 %1485  ;;  %v1222_v48 = vmul.f32 %v2740_v62, %v3733_v55  ;;  %v1289_v5 = vadd.f32 %v1225_v24, %v901_v16  ;;  %v1229_v61 = vmul.f32 %v2740_v62, %v3740_v31  ;;  %v3745_v24 = vld [vmem:[#allocation146_spill] sm:$0xff] }
 0x257   :  { %1730 = vst [vmem:[%s3404_s2 + $0x130] sm:$0xff] %v1666_v28  ;;  %1735 = vst [vmem:[%s3404_s2 + $0x158] sm:$0xff] %v1671_v15  ;;  %v1604_v59 = vmul.f32 %v2758_v25, %v1466_v40  ;;  %v1609_v23 = vmul.f32 %v2758_v25, %v1486_v12  ;;  %v898_v28 = vadd.f32 %v834_v43, %v510_v36  ;;  %v3735_v15 = vld [vmem:[#allocation128_spill] sm:$0xff]  ;;  %v3738_v12 = vld [vmem:[#allocation71_spill] sm:$0xff] }
 0x258   :  { %v836_v9 = vmul.f32 %v2734_v37, %v3735_v15  ;;  %v903_v10 = vadd.f32 %v839_v1, %v515_v42  ;;  %v512_v40 = vmul.f32 %v2744_v38, %v3737_v60  ;;  %v3746_v43 = vld [vmem:[#allocation8_spill] sm:$0xff]  ;;  %v845_v42 = vmul.f32 %v2734_v37, %v3748_v33 }
 0x259   :  { %v1668_v49 = vadd.f32 %v1604_v59, %v1280_v53  ;;  %v1673_v29 = vadd.f32 %v1609_v23, %v1285_v21  ;;  %v517_v21 = vmul.f32 %v2744_v38, %v3738_v12  ;;  %v1286_v52 = vadd.f32 %v1222_v48, %v898_v28  ;;  %v3749_v48 = vld [vmem:[#allocation72_spill] sm:$0xff]  ;;  %v3754_v12 = vld [vmem:[#allocation134_spill] sm:$0xff] }
 0x25a   :  { %v1474_v44 = vpop.permute.xlu1 %1473  ;;  %v1494_v41 = vpop.permute.xlu0 %1493  ;;  %v1224_v59 = vmul.f32 %v2740_v62, %v3739_v39  ;;  %v1291_v22 = vadd.f32 %v1227_v46, %v903_v10  ;;  %v1231_v16 = vmul.f32 %v2740_v62, %v3746_v43  ;;  %v3751_v46 = vld [vmem:[#allocation147_spill] sm:$0xff] }
 0x25b   :  { %1732 = vst [vmem:[%s3404_s2 + $0x140] sm:$0xff] %v1668_v49  ;;  %1737 = vst [vmem:[%s3404_s2 + $0x168] sm:$0xff] %v1673_v29  ;;  %v1606_v63 = vmul.f32 %v2758_v25, %v1474_v44  ;;  %v1611_v18 = vmul.f32 %v2758_v25, %v1494_v41  ;;  %v900_v49 = vadd.f32 %v836_v9, %v512_v40  ;;  %v3741_v29 = vld [vmem:[#allocation130_spill] sm:$0xff]  ;;  %v3744_v41 = vld [vmem:[#allocation73_spill] sm:$0xff] }
 0x25c   :  { %v838_v32 = vmul.f32 %v2734_v37, %v3741_v29  ;;  %v905_v11 = vadd.f32 %v841_v8, %v517_v21  ;;  %v514_v44 = vmul.f32 %v2744_v38, %v3743_v7  ;;  %v3752_v9 = vld [vmem:[#allocation151_spill] sm:$0xff]  ;;  %v847_v21 = vmul.f32 %v2734_v37, %v3754_v12 }
 0x25d   :  { %v1670_v50 = vadd.f32 %v1606_v63, %v1282_v51  ;;  %v1675_v35 = vadd.f32 %v1611_v18, %v1287_v56  ;;  %v519_v56 = vmul.f32 %v2744_v38, %v3744_v41  ;;  %v1288_v26 = vadd.f32 %v1224_v59, %v900_v49  ;;  %v3755_v59 = vld [vmem:[#allocation74_spill] sm:$0xff]  ;;  %v3760_v41 = vld [vmem:[#allocation136_spill] sm:$0xff] }
 0x25e   :  { %v1482_v14 = vpop.permute.xlu1 %1481  ;;  %v1502_v17 = vpop.permute.xlu0 %1501  ;;  %v1226_v63 = vmul.f32 %v2740_v62, %v3745_v24  ;;  %v1293_v4 = vadd.f32 %v1229_v61, %v905_v11  ;;  %v1233_v10 = vmul.f32 %v2740_v62, %v3752_v9  ;;  %v3757_v61 = vld [vmem:[#allocation148_spill] sm:$0xff] }
 0x25f   :  { %1734 = vst [vmem:[%s3404_s2 + $0x150] sm:$0xff] %v1670_v50  ;;  %1739 = vst [vmem:[%s3404_s2 + $0x178] sm:$0xff] %v1675_v35  ;;  %v1608_v2 = vmul.f32 %v2758_v25, %v1482_v14  ;;  %v1613_v54 = vmul.f32 %v2758_v25, %v1502_v17  ;;  %v902_v50 = vadd.f32 %v838_v32, %v514_v44  ;;  %v3747_v35 = vld [vmem:[#allocation132_spill] sm:$0xff]  ;;  %v3750_v17 = vld [vmem:[#allocation75_spill] sm:$0xff] }
 0x260   :  { %v840_v27 = vmul.f32 %v2734_v37, %v3747_v35  ;;  %v907_v36 = vadd.f32 %v843_v30, %v519_v56  ;;  %v516_v14 = vmul.f32 %v2744_v38, %v3749_v48  ;;  %v3758_v32 = vld [vmem:[#allocation81_spill] sm:$0xff]  ;;  %v849_v56 = vmul.f32 %v2734_v37, %v3760_v41 }
 0x261   :  { %v1672_v53 = vadd.f32 %v1608_v2, %v1284_v57  ;;  %v1677_v20 = vadd.f32 %v1613_v54, %v1289_v5  ;;  %v521_v5 = vmul.f32 %v2744_v38, %v3750_v17  ;;  %v1290_v3 = vadd.f32 %v1226_v63, %v902_v50  ;;  %v3761_v63 = vld [vmem:[#allocation76_spill] sm:$0xff]  ;;  %v3766_v17 = vld [vmem:[#allocation138_spill] sm:$0xff] }
 0x262   :  { %v1490_v23 = vpop.permute.xlu1 %1489  ;;  %v1510_v13 = vpop.permute.xlu0 %1509  ;;  %v1228_v2 = vmul.f32 %v2740_v62, %v3751_v46  ;;  %v1295_v15 = vadd.f32 %v1231_v16, %v907_v36  ;;  %v1235_v11 = vmul.f32 %v2740_v62, %v3758_v32  ;;  %v3763_v16 = vld [vmem:[#allocation149_spill] sm:$0xff] }
 0x263   :  { %1736 = vst [vmem:[%s3404_s2 + $0x160] sm:$0xff] %v1672_v53  ;;  %1741 = vst [vmem:[%s3404_s2 + $0x188] sm:$0xff] %v1677_v20  ;;  %v1610_v34 = vmul.f32 %v2758_v25, %v1490_v23  ;;  %v1615_v6 = vmul.f32 %v2758_v25, %v1510_v13  ;;  %v904_v53 = vadd.f32 %v840_v27, %v516_v14  ;;  %v3753_v20 = vld [vmem:[#allocation5_spill] sm:$0xff]  ;;  %v3756_v13 = vld [vmem:[#allocation11_spill] sm:$0xff] }
 0x264   :  { %v842_v60 = vmul.f32 %v2734_v37, %v3753_v20  ;;  %v909_v40 = vadd.f32 %v845_v42, %v521_v5  ;;  %v518_v23 = vmul.f32 %v2744_v38, %v3755_v59  ;;  %v3764_v27 = vld [vmem:[#allocation20_spill] sm:$0xff]  ;;  %v851_v5 = vmul.f32 %v2734_v37, %v3766_v17 }
 0x265   :  { %v1674_v51 = vadd.f32 %v1610_v34, %v1286_v52  ;;  %v1679_v0 = vadd.f32 %v1615_v6, %v1291_v22  ;;  %v523_v22 = vmul.f32 %v2744_v38, %v3756_v13  ;;  %v1292_v31 = vadd.f32 %v1228_v2, %v904_v53  ;;  %v3767_v2 = vld [vmem:[#allocation77_spill] sm:$0xff] }
 0x266   :  { %v1498_v18 = vpop.permute.xlu1 %1497  ;;  %v1518_v19 = vpop.permute.xlu0 %1517  ;;  %v1230_v34 = vmul.f32 %v2740_v62, %v3757_v61  ;;  %v1297_v29 = vadd.f32 %v1233_v10, %v909_v40  ;;  %v1237_v36 = vmul.f32 %v2740_v62, %v3764_v27  ;;  %v3769_v10 = vld [vmem:[#allocation150_spill] sm:$0xff] }
 0x267   :  { %1738 = vst [vmem:[%s3404_s2 + $0x170] sm:$0xff] %v1674_v51  ;;  %1743 = vst [vmem:[%s3404_s2 + $0x198] sm:$0xff] %v1679_v0  ;;  %v1612_v45 = vmul.f32 %v2758_v25, %v1498_v18  ;;  %v1617_v1 = vmul.f32 %v2758_v25, %v1518_v19  ;;  %v906_v51 = vadd.f32 %v842_v60, %v518_v23  ;;  %v3759_v0 = vld [vmem:[#allocation7_spill] sm:$0xff]  ;;  %v3762_v19 = vld [vmem:[#allocation13_spill] sm:$0xff] }
 0x268   :  { %v844_v7 = vmul.f32 %v2734_v37, %v3759_v0  ;;  %v911_v44 = vadd.f32 %v847_v21, %v523_v22  ;;  %v520_v18 = vmul.f32 %v2744_v38, %v3761_v63  ;;  %v3770_v60 = vld [vmem:[#allocation14_spill] sm:$0xff]  ;;  %v3774_v0 = vld [vmem:[#allocation137_spill] sm:$0xff] }
 0x269   :  { %v1676_v57 = vadd.f32 %v1612_v45, %v1288_v26  ;;  %v1681_v55 = vadd.f32 %v1617_v1, %v1293_v4  ;;  %v525_v4 = vmul.f32 %v2744_v38, %v3762_v19  ;;  %v1294_v43 = vadd.f32 %v1230_v34, %v906_v51 }
 0x26a   :  { %v1506_v54 = vpop.permute.xlu1 %1505  ;;  %v1526_v28 = vpop.permute.xlu0 %1525  ;;  %v1232_v45 = vmul.f32 %v2740_v62, %v3763_v16  ;;  %v1299_v35 = vadd.f32 %v1235_v11, %v911_v44  ;;  %v1239_v40 = vmul.f32 %v2740_v62, %v3770_v60 }
 0x26b   :  { %1740 = vst [vmem:[%s3404_s2 + $0x180] sm:$0xff] %v1676_v57  ;;  %1745 = vst [vmem:[%s3404_s2 + $0x1a8] sm:$0xff] %v1681_v55  ;;  %v1614_v47 = vmul.f32 %v2758_v25, %v1506_v54  ;;  %v1619_v8 = vmul.f32 %v2758_v25, %v1526_v28  ;;  %v908_v57 = vadd.f32 %v844_v7, %v520_v18  ;;  %v3765_v55 = vld [vmem:[#allocation9_spill] sm:$0xff]  ;;  %v3768_v28 = vld [vmem:[#allocation16_spill] sm:$0xff] }
 0x26c   :  { %v846_v48 = vmul.f32 %v2734_v37, %v3765_v55  ;;  %v913_v14 = vadd.f32 %v849_v56, %v525_v4  ;;  %v522_v54 = vmul.f32 %v2744_v38, %v3767_v2  ;;  %v850_v7 = vmul.f32 %v2734_v37, %v3774_v0  ;;  %v3776_v18 = vld [vmem:[#allocation153_spill] sm:$0xff] }
 0x26d   :  { %v1678_v52 = vadd.f32 %v1614_v47, %v1290_v3  ;;  %v1683_v39 = vadd.f32 %v1619_v8, %v1295_v15  ;;  %v527_v15 = vmul.f32 %v2744_v38, %v3768_v28  ;;  %v1296_v9 = vadd.f32 %v1232_v45, %v908_v57 }
 0x26e   :  { %v1514_v6 = vpop.permute.xlu1 %1513  ;;  %v1534_v49 = vpop.permute.xlu0 %1533  ;;  %v1234_v47 = vmul.f32 %v2740_v62, %v3769_v10  ;;  %v1301_v20 = vadd.f32 %v1237_v36, %v913_v14  ;;  %v1238_v19 = vmul.f32 %v2740_v62, %v3776_v18 }
 0x26f   :  { %1742 = vst [vmem:[%s3404_s2 + $0x190] sm:$0xff] %v1678_v52  ;;  %1747 = vst [vmem:[%s3404_s2 + $0x1b8] sm:$0xff] %v1683_v39  ;;  %v1616_v58 = vmul.f32 %v2758_v25, %v1514_v6  ;;  %v1621_v30 = vmul.f32 %v2758_v25, %v1534_v49  ;;  %v910_v52 = vadd.f32 %v846_v48, %v522_v54  ;;  %v3771_v39 = vld [vmem:[#allocation135_spill] sm:$0xff] }
 0x270   :  { %v848_v59 = vmul.f32 %v2734_v37, %v3771_v39  ;;  %v915_v23 = vadd.f32 %v851_v5, %v527_v15 }
 0x271   :  { %v1680_v26 = vadd.f32 %v1616_v58, %v1292_v31  ;;  %v1685_v24 = vadd.f32 %v1621_v30, %v1297_v29  ;;  %v3772_v31 = vld [vmem:[#allocation78_spill] sm:$0xff]  ;;  %v1298_v34 = vadd.f32 %v1234_v47, %v910_v52  ;;  %v3773_v29 = vld [vmem:[#allocation152_spill] sm:$0xff] }
 0x272   :  { %v1522_v1 = vpop.permute.xlu1 %1521  ;;  %v1542_v50 = vpop.permute.xlu0 %1541  ;;  %v524_v61 = vmul.f32 %v2744_v38, %v3772_v31  ;;  %v1236_v32 = vmul.f32 %v2740_v62, %v3773_v29  ;;  %v1303_v11 = vadd.f32 %v1239_v40, %v915_v23 }
 0x273   :  { %1744 = vst [vmem:[%s3404_s2 + $0x1a0] sm:$0xff] %v1680_v26  ;;  %1749 = vst [vmem:[%s3404_s2 + $0x1c8] sm:$0xff] %v1685_v24  ;;  %v1618_v33 = vmul.f32 %v2758_v25, %v1522_v1  ;;  %v1623_v42 = vmul.f32 %v2758_v25, %v1542_v50  ;;  %v3775_v26 = vld [vmem:[#allocation79_spill] sm:$0xff] }
 0x274   :  { %v912_v51 = vadd.f32 %v848_v59, %v524_v61  ;;  %v526_v24 = vmul.f32 %v2744_v38, %v3775_v26 }
 0x275   :  { %v1682_v3 = vadd.f32 %v1618_v33, %v1294_v43  ;;  %v1687_v46 = vadd.f32 %v1623_v42, %v1299_v35 }
 0x276   :  { %v1530_v8 = vpop.permute.xlu1 %1529  ;;  %v1550_v53 = vpop.permute.xlu0 %1549  ;;  %v1300_v63 = vadd.f32 %v1236_v32, %v912_v51  ;;  %v914_v4 = vadd.f32 %v850_v7, %v526_v24 }
 0x277   :  { %1746 = vst [vmem:[%s3404_s2 + $0x1b0] sm:$0xff] %v1682_v3  ;;  %1751 = vst [vmem:[%s3404_s2 + $0x1d8] sm:$0xff] %v1687_v46  ;;  %v1620_v12 = vmul.f32 %v2758_v25, %v1530_v8  ;;  %v1625_v21 = vmul.f32 %v2758_v25, %v1550_v53 }
 0x278   :  { %v1302_v45 = vadd.f32 %v1238_v19, %v914_v4 }
 0x279   :  { %v1684_v13 = vadd.f32 %v1620_v12, %v1296_v9  ;;  %v1689_v22 = vadd.f32 %v1625_v21, %v1301_v20 }
 0x27a   :  { %v1538_v6 = vpop.permute.xlu1 %1537  ;;  %v1558_v49 = vpop.permute.xlu0 %1557 }
 0x27b   :  { %1748 = vst [vmem:[%s3404_s2 + $0x1c0] sm:$0xff] %v1684_v13  ;;  %1753 = vst [vmem:[%s3404_s2 + $0x1e8] sm:$0xff] %v1689_v22  ;;  %v1622_v58 = vmul.f32 %v2758_v25, %v1538_v6  ;;  %v1627_v30 = vmul.f32 %v2758_v25, %v1558_v49 }
 0x27d   :  { %v1686_v44 = vadd.f32 %v1622_v58, %v1298_v34  ;;  %v1691_v41 = vadd.f32 %v1627_v30, %v1303_v11 }
 0x27e   :  { %v1546_v56 = vpop.permute.xlu1 %1545 }
 0x27f   :  { %1750 = vst [vmem:[%s3404_s2 + $0x1d0] sm:$0xff] %v1686_v44  ;;  %1755 = vst [vmem:[%s3404_s2 + $0x1f8] sm:$0xff] %v1691_v41  ;;  %v1624_v37 = vmul.f32 %v2758_v25, %v1546_v56 }
 0x281   :  { %v1688_v43 = vadd.f32 %v1624_v37, %v1300_v63 }
 0x282   :  { %v1554_v16 = vpop.permute.xlu1 %1553 }
 0x283   :  { %1752 = vst [vmem:[%s3404_s2 + $0x1e0] sm:$0xff] %v1688_v43  ;;  %v1626_v38 = vmul.f32 %v2758_v25, %v1554_v16 }
 0x285   :  { %v1690_v62 = vadd.f32 %v1626_v38, %v1302_v45 }
 0x287   :  { %1754 = vst [vmem:[%s3404_s2 + $0x1f0] sm:$0xff] %v1690_v62 }

// kernel: deconv_block.4
= control target key start
LH: loop header
LB: loop body
LE: loop exit
PB: predicated region body
PF: predicated region fallthrough
CT: control target
= control target key end

     0   :  { %s378_s9 = smov 0   ;;  %s380_s10 = smov 0   ;;  %s424_s0 = inlined_call_operand.vmem [shape: f32[128,128], index: 0, kind: input, shape index: {}]   ;;  %s425_s1 = inlined_call_operand.vmem [shape: f32[2,1,128], index: 1, kind: output, shape index: {0}]   ;;  %s426_s2 = inlined_call_operand.vmem [shape: f32[2,1,128], index: 2, kind: output, shape index: {1}]  }
   0x1   :  { %s382_s11 = smov 0  }
   0x2 LB: > { %s25_s12 = sadd.s32 1, %s356_s10  ;;  %p308_p0 = scmp.ge.s32.totalorder %s360_s11, 1  ;;  %s360_s11 = sphi %s382_s11, %s13_s11   ;;  %s356_s10 = sphi %s380_s10, %s428_s10   ;;  %s352_s9 = sphi %s378_s9, %s427_s9  }
   0x3   : > { %p27_p1 = scmp.ge.s32.totalorder %s25_s12, 2  ;;  %p132_p2 = scmp.lt.s32.totalorder %s360_s11, 3 }
   0x5   : > { %s430_s12 = smov (%p27_p1, %s25_s12), 0  ;;  %p133_p3 = pnand %p308_p0, %p132_p2 }
   0x6   : > { %p164_p4 = scmp.lt.s32.totalorder (!%p133_p3), %s352_s9, 1  ;;  %s309_s13 = sshll.u32 (!%p133_p3), %s352_s9, 3 }
   0x7   : > { %136 = sbr.rel (%p133_p3) target bundleno = 48 (0x30), region = 24  ;;  %p158_p5 = scmp.lt.s32.totalorder (!%p133_p3), %s309_s13, 15 }
   0xc   : > { %s432_s9 = smov (!%p164_p4, %s352_s9), 1  ;;  %s434_s13 = smov (!%p158_p5, %s309_s13), 15  ;;  %v362_v0 = vmov 0.0  }
   0xd   : > { %s399_s16 = scalar_lea.vmem %s425_s1, %s432_s9  ;;  %s404_s19 = scalar_lea.vmem %s426_s2, %s432_s9 }
   0xe   : > { %174 = vst [vmem:[%s399_s16] sm:$0x1] %v362_v0  ;;  %175 = vst [vmem:[%s404_s19] sm:$0x1] %v362_v0  ;;  %s310_s20 = sshll.u32 %s434_s13, 3 }
   0xf   : > { %s161_s23 = scalar_lea.vmem %s424_s0, %s310_s20 }
  0x10   : > { %v176_v1 = vld [vmem:[%s161_s23] sm:$0xff]  ;;  %v177_v2 = vld [vmem:[%s161_s23 + $0x8] sm:$0xff]  ;;  %v178_v3 = vld [vmem:[%s161_s23 + $0x10] sm:$0xff] }
  0x11   : > { %v179_v4 = vld [vmem:[%s161_s23 + $0x18] sm:$0xff]  ;;  %v185_v5 = vadd.f32 %v177_v2, %v176_v1  ;;  %v201_v6 = vmul.f32 %v176_v1, %v176_v1  ;;  %v202_v7 = vmul.f32 %v177_v2, %v177_v2  ;;  %v203_v8 = vmul.f32 %v178_v3, %v178_v3  ;;  %v180_v9 = vld [vmem:[%s161_s23 + $0x20] sm:$0xff]  ;;  %v181_v13 = vld [vmem:[%s161_s23 + $0x28] sm:$0xff] }
  0x12   : > { %v204_v11 = vmul.f32 %v179_v4, %v179_v4  ;;  %v205_v15 = vmul.f32 %v180_v9, %v180_v9  ;;  %v182_v17 = vld [vmem:[%s161_s23 + $0x30] sm:$0xff]  ;;  %v206_v19 = vmul.f32 %v181_v13, %v181_v13  ;;  %v183_v21 = vld [vmem:[%s161_s23 + $0x38] sm:$0xff] }
  0x13   : > { %v186_v10 = vadd.f32 %v185_v5, %v178_v3  ;;  %v209_v12 = vadd.f32 %v202_v7, %v201_v6  ;;  %v207_v23 = vmul.f32 %v182_v17, %v182_v17  ;;  %v208_v26 = vmul.f32 %v183_v21, %v183_v21 }
  0x15   : > { %v187_v14 = vadd.f32 %v186_v10, %v179_v4  ;;  %v210_v16 = vadd.f32 %v209_v12, %v203_v8  ;;  %v184_v40 = vld [vmem:[%s399_s16] sm:$0x1] }
  0x16   : > { %v200_v43 = vld [vmem:[%s404_s19] sm:$0x1] }
  0x17   : > { %v188_v18 = vadd.f32 %v187_v14, %v180_v9  ;;  %v211_v20 = vadd.f32 %v210_v16, %v204_v11 }
  0x19   : > { %v189_v22 = vadd.f32 %v188_v18, %v181_v13  ;;  %v212_v24 = vadd.f32 %v211_v20, %v205_v15 }
  0x1b   : > { %v190_v25 = vadd.f32 %v189_v22, %v182_v17  ;;  %v213_v27 = vadd.f32 %v212_v24, %v206_v19 }
  0x1d   : > { %v191_v28 = vadd.f32 %v190_v25, %v183_v21  ;;  %v214_v29 = vadd.f32 %v213_v27, %v207_v23 }
  0x1f   : > { %v192_v30 = vrot.slane %v191_v28, 4  ;;  %v215_v31 = vadd.f32 %v214_v29, %v208_v26 }
  0x21   : > { %v193_v32 = vadd.f32 %v192_v30, %v191_v28  ;;  %v216_v33 = vrot.slane %v215_v31, 4 }
  0x23   : > { %v194_v34 = vrot.slane %v193_v32, 2  ;;  %v217_v35 = vadd.f32 %v216_v33, %v215_v31 }
  0x25   : > { %v195_v36 = vadd.f32 %v194_v34, %v193_v32  ;;  %v218_v37 = vrot.slane %v217_v35, 2 }
  0x27   : > { %v196_v38 = vrot.slane %v195_v36, 1  ;;  %v219_v39 = vadd.f32 %v218_v37, %v217_v35 }
  0x29   : > { %v197_v41 = vadd.f32 %v196_v38, %v195_v36  ;;  %v220_v42 = vrot.slane %v219_v39, 1 }
  0x2b   : > { %v198_v44 = vadd.f32 %v197_v41, %v184_v40  ;;  %v221_v45 = vadd.f32 %v220_v42, %v219_v39 }
  0x2d   : > { %199 = vst [vmem:[%s399_s16] sm:$0x1] %v198_v44  ;;  %v222_v46 = vadd.f32 %v221_v45, %v200_v43 }
  0x2f   : > { %223 = vst [vmem:[%s404_s19] sm:$0x1] %v222_v46 }
  0x30 PF: > { %s13_s11 = sadd.s32 1, %s360_s11   ;;  %s427_s9 = smov %s356_s10 }
  0x31   : > { %p10_p6 = scmp.ge.s32.totalorder %s13_s11, 4   ;;  %s428_s10 = smov %s430_s12 }
  0x33   :  { %12 = sbr.rel (!%p10_p6) target bundleno = 2 (0x2), region = 70 }

// kernel: tile.13
= control target key start
LH: loop header
LB: loop body
LE: loop exit
PB: predicated region body
PF: predicated region fallthrough
CT: control target
= control target key end

     0   :  { %s28_s0 = inlined_call_operand.vmem [shape: f32[8], index: 0, kind: input, shape index: {}]   ;;  %s29_s1 = inlined_call_operand.vmem [shape: f32[16,8], index: 1, kind: output, shape index: {}]  }
   0x1   :  { %v4_v0 = vld [vmem:[%s28_s0] ss:$0 sm:$0xff] }
   0x2   :  { %5 = vst [vmem:[%s29_s1] sm:$0xff] %v4_v0  ;;  %8 = vst [vmem:[%s29_s1 + $0x8] sm:$0xff] %v4_v0 }

// kernel: tile.14
= control target key start
LH: loop header
LB: loop body
LE: loop exit
PB: predicated region body
PF: predicated region fallthrough
CT: control target
= control target key end

     0   :  { %s133_s10 = smov 120   ;;  %s134_s11 = smov 104   ;;  %vm3_vm0 = vcmask 64512   ;;  %vm9_vm1 = vcmask 1048512   ;;  %vm15_vm2 = vcmask 982912   ;;  %vm21_vm3 = vcmask 917312   ;;  %s209_s0 = inlined_call_operand.vmem [shape: f32[16,8], index: 0, kind: input, shape index: {}]   ;;  %s210_s1 = inlined_call_operand.vmem [shape: f32[1,128], index: 1, kind: output, shape index: {}]  }
   0x1   :  { %v103_v0 = vld [vmem:[%s209_s0 + $0xf] sm:$0x1]   ;;  %v105_v1 = vld [vmem:[%s209_s0 + $0xd] sm:$0x1]   ;;  %v104_v2 = vld [vmem:[%s209_s0 + $0xe] sm:$0x1]  }
   0x2   :  { %7 = vrot.lane.b32.xlu0 %v103_v0, %s133_s10  ;;  %19 = vrot.lane.b32.xlu1 %v105_v1, %s134_s11  ;;  %v106_v3 = vld [vmem:[%s209_s0 + $0xc] sm:$0x1]   ;;  %s135_s16 = smov 112   ;;  %s136_s17 = smov 96   ;;  %v107_v4 = vld [vmem:[%s209_s0 + $0xb] sm:$0x1]  }
   0x3   :  { %v108_v5 = vld [vmem:[%s209_s0 + $0xa] sm:$0x1]   ;;  %v2_v6 = vld [vmem:[%s209_s0] sm:$0x1]   ;;  %s137_s24 = smov 88   ;;  %s138_s25 = smov 80  }
   0x4   :  { %4 = vst.msk [vmem:[#allocation0] sm:$0x1] %vm3_vm0, %v2_v6   ;;  %v109_v7 = vld [vmem:[%s209_s0 + $0x9] sm:$0x1]   ;;  %v110_v8 = vld [vmem:[%s209_s0 + $0x8] sm:$0x1]  }
   0x5   :  { %s139_s30 = smov 72   ;;  %s140_s2 = smov 64   ;;  %v111_v9 = vld [vmem:[%s209_s0 + $0x7] sm:$0x1]   ;;  %v112_v10 = vld [vmem:[%s209_s0 + $0x6] sm:$0x1]  }
   0x6   :  { %13 = vrot.lane.b32.xlu0 %v104_v2, %s135_s16  ;;  %25 = vrot.lane.b32.xlu1 %v106_v3, %s136_s17  ;;  %s141_s7 = smov 56   ;;  %s142_s8 = smov 48   ;;  %v113_v11 = vld [vmem:[%s209_s0 + $0x5] sm:$0x1]   ;;  %v114_v12 = vld [vmem:[%s209_s0 + $0x4] sm:$0x1]  }
   0x7   :  { %s143_s13 = smov 40   ;;  %s144_s14 = smov 32   ;;  %v115_v13 = vld [vmem:[%s209_s0 + $0x3] sm:$0x1]   ;;  %v116_v14 = vld [vmem:[%s209_s0 + $0x2] sm:$0x1]  }
   0x8   :  { %s145_s19 = smov 24   ;;  %s146_s20 = smov 16   ;;  %v117_v15 = vld [vmem:[%s209_s0 + $0x1] sm:$0x1]   ;;  %vm27_vm4 = vcmask 851712   ;;  %vm33_vm5 = vcmask 786112  }
   0x9   :  { %s147_s0 = smov 8   ;;  %vm39_vm6 = vcmask 720512   ;;  %vm45_vm7 = vcmask 654912   ;;  %vm51_vm8 = vcmask 589312   ;;  %vm57_vm9 = vcmask 523712  }
   0xa   :  { %31 = vrot.lane.b32.xlu0 %v107_v4, %s137_s24  ;;  %37 = vrot.lane.b32.xlu1 %v108_v5, %s138_s25  ;;  %vm63_vm10 = vcmask 458112   ;;  %vm69_vm11 = vcmask 392512   ;;  %vm75_vm12 = vcmask 326912   ;;  %vm81_vm13 = vcmask 261312  }
   0xb   :  { %vm87_vm14 = vcmask 195712   ;;  %vm93_vm15 = vcmask 130112  }
   0xe   :  { %43 = vrot.lane.b32.xlu0 %v109_v7, %s139_s30  ;;  %49 = vrot.lane.b32.xlu1 %v110_v8, %s140_s2 }
  0x12   :  { %55 = vrot.lane.b32.xlu0 %v111_v9, %s141_s7  ;;  %61 = vrot.lane.b32.xlu1 %v112_v10, %s142_s8 }
  0x16   :  { %67 = vrot.lane.b32.xlu0 %v113_v11, %s143_s13  ;;  %73 = vrot.lane.b32.xlu1 %v114_v12, %s144_s14 }
  0x1a   :  { %79 = vrot.lane.b32.xlu0 %v115_v13, %s145_s19  ;;  %85 = vrot.lane.b32.xlu1 %v116_v14, %s146_s20 }
  0x1e   :  { %91 = vrot.lane.b32.xlu0 %v117_v15, %s147_s0 }
  0x74   :  { %v8_v16 = vpop.permute.xlu0 %7   ;;  %v20_v17 = vpop.permute.xlu1 %19  }
  0x75   :  { %10 = vst.msk [vmem:[#allocation0] sm:$0x1] %vm9_vm1, %v8_v16  }
  0x78   :  { %v14_v18 = vpop.permute.xlu0 %13   ;;  %v26_v19 = vpop.permute.xlu1 %25  }
  0x79   :  { %16 = vst.msk [vmem:[#allocation0] sm:$0x1] %vm15_vm2, %v14_v18  }
  0x7a   :  { %22 = vst.msk [vmem:[#allocation0] sm:$0x1] %vm21_vm3, %v20_v17  }
  0x7b   :  { %28 = vst.msk [vmem:[#allocation0] sm:$0x1] %vm27_vm4, %v26_v19  }
  0x7c   :  { %v32_v20 = vpop.permute.xlu0 %31   ;;  %v38_v21 = vpop.permute.xlu1 %37  }
  0x7d   :  { %34 = vst.msk [vmem:[#allocation0] sm:$0x1] %vm33_vm5, %v32_v20  }
  0x7e   :  { %40 = vst.msk [vmem:[#allocation0] sm:$0x1] %vm39_vm6, %v38_v21  }
  0x80   :  { %v44_v22 = vpop.permute.xlu0 %43   ;;  %v50_v23 = vpop.permute.xlu1 %49  }
  0x81   :  { %46 = vst.msk [vmem:[#allocation0] sm:$0x1] %vm45_vm7, %v44_v22  }
  0x82   :  { %52 = vst.msk [vmem:[#allocation0] sm:$0x1] %vm51_vm8, %v50_v23  }
  0x84   :  { %v56_v24 = vpop.permute.xlu0 %55   ;;  %v62_v25 = vpop.permute.xlu1 %61  }
  0x85   :  { %58 = vst.msk [vmem:[#allocation0] sm:$0x1] %vm57_vm9, %v56_v24  }
  0x86   :  { %64 = vst.msk [vmem:[#allocation0] sm:$0x1] %vm63_vm10, %v62_v25  }
  0x88   :  { %v68_v26 = vpop.permute.xlu0 %67   ;;  %v74_v27 = vpop.permute.xlu1 %73  }
  0x89   :  { %70 = vst.msk [vmem:[#allocation0] sm:$0x1] %vm69_vm11, %v68_v26  }
  0x8a   :  { %76 = vst.msk [vmem:[#allocation0] sm:$0x1] %vm75_vm12, %v74_v27  }
  0x8c   :  { %v80_v28 = vpop.permute.xlu0 %79   ;;  %v86_v29 = vpop.permute.xlu1 %85  }
  0x8d   :  { %82 = vst.msk [vmem:[#allocation0] sm:$0x1] %vm81_vm13, %v80_v28  }
  0x8e   :  { %88 = vst.msk [vmem:[#allocation0] sm:$0x1] %vm87_vm14, %v86_v29  }
  0x90   :  { %v92_v30 = vpop.permute.xlu0 %91  }
  0x91   :  { %94 = vst.msk [vmem:[#allocation0] sm:$0x1] %vm93_vm15, %v92_v30  }
  0x98   :  { %v99_v31 = vld [vmem:[#allocation0] sm:$0x1] }
  0x99   :  { %102 = vst [vmem:[%s210_s1] sm:$0x1] %v99_v31 }

// kernel: deconv_block.5
= control target key start
LH: loop header
LB: loop body
LE: loop exit
PB: predicated region body
PF: predicated region fallthrough
CT: control target
= control target key end

     0   :  { %s325_s12 = smov 0   ;;  %s348_s0 = inlined_call_operand.vmem [shape: f32[128,128], index: 0, kind: input, shape index: {}, may-alias: {0,3}]   ;;  %s349_s1 = inlined_call_operand.vmem [shape: f32[1,128], index: 1, kind: input, shape index: {}]   ;;  %s350_s2 = inlined_call_operand.vmem [shape: f32[1,128], index: 2, kind: input, shape index: {}]   ;;  %s351_s3 = inlined_call_operand.vmem [shape: f32[128,128], index: 3, kind: output, shape index: {}, may-alias: {0,3}]  }
   0x1 LB: > { %s276_s13 = sadd.s32 4294967295, %s303_s12   ;;  %p280_p0 = scmp.ge.s32.totalorder %s303_s12, 1  ;;  %s303_s12 = sphi %s325_s12, %s13_s12  }
   0x2   : > { %p138_p1 = scmp.lt.s32.totalorder %s303_s12, 3 }
   0x4   : > { %p139_p2 = pnand %p280_p0, %p138_p1 }
   0x5   : > { %s281_s14 = sshll.u32 (!%p139_p2), %s276_s13, 3 }
   0x6   : > { %142 = sbr.rel (%p139_p2) target bundleno = 23 (0x17), region = 32  ;;  %p163_p3 = scmp.lt.s32.totalorder (!%p139_p2), %s281_s14, 15 }
   0xb   : > { %s353_s14 = smov (!%p163_p3, %s281_s14), 15  ;;  %v285_v0 = vld [vmem:[%s349_s1] ss:$0 sm:$0xff] }
   0xc   : > { %s282_s15 = sshll.u32 %s353_s14, 3  ;;  %v286_v1 = vld [vmem:[%s350_s2] ss:$0 sm:$0xff] }
   0xd   : > { %s166_s20 = scalar_lea.vmem %s348_s0, %s282_s15  ;;  %s172_s25 = scalar_lea.vmem %s351_s3, %s282_s15 }
   0xe   : > { %v174_v2 = vld [vmem:[%s166_s20] sm:$0xff]  ;;  %v175_v3 = vld [vmem:[%s166_s20 + $0x8] sm:$0xff]  ;;  %v176_v4 = vld [vmem:[%s166_s20 + $0x10] sm:$0xff] }
   0xf   : > { %v177_v5 = vld [vmem:[%s166_s20 + $0x18] sm:$0xff]  ;;  %v178_v6 = vld [vmem:[%s166_s20 + $0x20] sm:$0xff]  ;;  %v179_v7 = vld [vmem:[%s166_s20 + $0x28] sm:$0xff]  ;;  %v189_v8 = vmul.f32 %v285_v0, %v174_v2  ;;  %v190_v9 = vmul.f32 %v285_v0, %v175_v3  ;;  %v191_v10 = vmul.f32 %v285_v0, %v176_v4 }
  0x10   : > { %v180_v11 = vld [vmem:[%s166_s20 + $0x30] sm:$0xff]  ;;  %v181_v12 = vld [vmem:[%s166_s20 + $0x38] sm:$0xff]  ;;  %v192_v13 = vmul.f32 %v285_v0, %v177_v5  ;;  %v193_v14 = vmul.f32 %v285_v0, %v178_v6  ;;  %v194_v15 = vmul.f32 %v285_v0, %v179_v7 }
  0x11   : > { %v195_v16 = vmul.f32 %v285_v0, %v180_v11  ;;  %v196_v17 = vmul.f32 %v285_v0, %v181_v12  ;;  %v204_v18 = vadd.f32 %v286_v1, %v189_v8  ;;  %v205_v19 = vadd.f32 %v286_v1, %v190_v9 }
  0x12   : > { %v206_v20 = vadd.f32 %v286_v1, %v191_v10  ;;  %v207_v21 = vadd.f32 %v286_v1, %v192_v13  ;;  %v208_v22 = vadd.f32 %v286_v1, %v193_v14  ;;  %v209_v23 = vadd.f32 %v286_v1, %v194_v15 }
  0x13   : > { %v210_v24 = vadd.f32 %v286_v1, %v195_v16  ;;  %v211_v25 = vadd.f32 %v286_v1, %v196_v17  ;;  %212 = vst [vmem:[%s172_s25] sm:$0xff] %v204_v18  ;;  %213 = vst [vmem:[%s172_s25 + $0x8] sm:$0xff] %v205_v19 }
  0x14   : > { %214 = vst [vmem:[%s172_s25 + $0x10] sm:$0xff] %v206_v20  ;;  %215 = vst [vmem:[%s172_s25 + $0x18] sm:$0xff] %v207_v21 }
  0x15   : > { %216 = vst [vmem:[%s172_s25 + $0x20] sm:$0xff] %v208_v22  ;;  %217 = vst [vmem:[%s172_s25 + $0x28] sm:$0xff] %v209_v23 }
  0x16   : > { %218 = vst [vmem:[%s172_s25 + $0x30] sm:$0xff] %v210_v24  ;;  %219 = vst [vmem:[%s172_s25 + $0x38] sm:$0xff] %v211_v25 }
  0x17 PF: > { %s13_s12 = sadd.s32 1, %s303_s12  }
  0x18   : > { %p10_p4 = scmp.ge.s32.totalorder %s13_s12, 4  }
  0x1a   :  { %12 = sbr.rel (!%p10_p4) target bundleno = 1 (0x1), region = 62 }

</bundles_post_ra>
